<compile_context>
chip_gen: v6e
topology: v6e:2x2x1
jax: 0.10.0
libtpu: 0.0.40
codegen_flags: <defaults>
</compile_context>

<pallas_src>
import jax
import jax.numpy as jnp
from jax.experimental import pallas as pl
from jax.experimental.pallas import tpu as pltpu

# ----------------------------------------------------------------------------
# Model hyper-parameters (the module's globals).  Small, TPU-friendly values.
# ----------------------------------------------------------------------------
INPUT_DIM = 16
HIDDEN = 32
NUM_LAYERS = 2
DROPOUT = 0.0          # eval mode -> identity anyway
BATCH = 2
SEQ = 8
OUT_DIM = 2
LANE = 128             # TPU lane width
MXU_DTYPE = jnp.bfloat16

assert 4 * HIDDEN == LANE, "packing below assumes one gate block == 128 lanes"


# ----------------------------------------------------------------------------
# Fused kernel: wavefronted 2-layer LSTM + (folded) LayerNorm + Linear head.
# Runs once (grid=(1,)); total live data well under 200 KB of VMEM.
# ----------------------------------------------------------------------------
def _fused_lstm_kernel(x_ref, h0_ref, c0_ref, wslab_ref, wwave_ref, bslab_ref,
                       out_ref):
    T, B, Din = x_ref.shape
    L, _, H = h0_ref.shape
    H4 = 4 * H
    H8 = 8 * H

    # ---- packed parameters (prepared once at init; see pack_params) --------
    w_in = wslab_ref[0:Din, :]                 # (Din, 8H) bf16: [W_ih0^T | 0]
    w_head = wslab_ref[Din:Din + H, 0:LANE]    # (H, 128) bf16: LN affine folded in
    w_wave = wwave_ref[...]                    # (2H, 8H) f32 wavefront block weight
    b_in = bslab_ref[0:1, :]                   # (1, 8H) f32: [b0 | b1]
    b_head = bslab_ref[1:2, 0:LANE]            # (1, 128) f32

    # ---- hoisted input projection (off the serial critical path) -----------
    # xp[d, :, :4H] = x_d @ W_ih0^T + b0   (layer-0 feed-forward term, step d)
    # xp[d, :, 4H:] = b1                   (layer-1 bias; its feed-forward term
    #                                       y0 @ W_ih1^T lives in the wavefront dot)
    x_tb = x_ref[...].reshape(T * B, Din)                         # time-major flatten
    xp = (jnp.dot(x_tb.astype(MXU_DTYPE), w_in,
                  preferred_element_type=jnp.float32) + b_in)     # (T*B, 8H) f32
    xp = xp.reshape(T, B, H8)

    h0 = h0_ref[0]
    c0 = c0_ref[0]
    h1 = h0_ref[1]
    c1 = c0_ref[1]

    # ---- wavefront recurrence: T+1 diagonals instead of 2*T serial steps ---
    # Single-sigmoid trick: g-gate pre-activations were pre-scaled by 2, so
    # tanh(pre_g) == 2*sigmoid(2*pre_g) - 1 == 2*s_g - 1.
    ys = []
    for d in range(T + 1):                     # static -> fully unrolled
        lhs = jnp.concatenate([h0, h1], axis=1)                          # (B, 2H)
        z = jnp.dot(lhs, w_wave, preferred_element_type=jnp.float32)     # (B, 8H)
        add = xp[d] if d < T else b_in         # last diagonal: layer-1 half only
        s = jax.nn.sigmoid(z + add)            # ONE transcendental pass, both layers

        if d >= 1:                             # layer-1, step t = d-1
            i1 = s[:, H4 + 0 * H:H4 + 1 * H]
            f1 = s[:, H4 + 1 * H:H4 + 2 * H]
            g1 = 2.0 * s[:, H4 + 2 * H:H4 + 3 * H] - 1.0
            o1 = s[:, H4 + 3 * H:H4 + 4 * H]
            c1 = f1 * c1 + i1 * g1
            h1 = o1 * jnp.tanh(c1)
            ys.append(h1)
        if d < T:                              # layer-0, step t = d
            i0 = s[:, 0 * H:1 * H]
            f0 = s[:, 1 * H:2 * H]
            g0 = 2.0 * s[:, 2 * H:3 * H] - 1.0
            o0 = s[:, 3 * H:4 * H]
            c0 = f0 * c0 + i0 * g0
            h0 = o0 * jnp.tanh(c0)

    # ---- head: LayerNorm (affine folded into w_head/b_head) + Linear -------
    y = jnp.stack(ys, axis=1).reshape(B * T, H)       # batch-major rows (b*T + t)
    mean = jnp.mean(y, axis=-1, keepdims=True)
    diff = y - mean
    var = jnp.mean(diff * diff, axis=-1, keepdims=True)       # biased, like PyTorch
    norm = diff * jax.lax.rsqrt(var + 1e-5)
    out2d = (jnp.dot(norm.astype(MXU_DTYPE), w_head,
                     preferred_element_type=jnp.float32) + b_head)   # (B*T, 128)

    # ---- single lane-dense output slab: [out | h_final | c_final] ----------
    hc = jnp.concatenate([h0, h1, c0, c1], axis=0)                    # (2*L*B, H)
    hc_pad = jnp.concatenate(
        [hc, jnp.zeros((2 * L * B, LANE - H), jnp.float32)], axis=1)  # (8, 128)
    out_ref[...] = jnp.concatenate([out2d, hc_pad], axis=0)           # (24, 128)


# ----------------------------------------------------------------------------
# Parameter construction (mirrors nn.LSTM / nn.LayerNorm / nn.Linear shapes).
# PyTorch init is U(-1/sqrt(H), 1/sqrt(H)).
# ----------------------------------------------------------------------------
def init_params(key, input_dim, hidden, num_layers):
    bound = 1.0 / jnp.sqrt(jnp.float32(hidden))
    params = {"lstm": []}
    for layer in range(num_layers):
        d_in = input_dim if layer == 0 else hidden
        key, k1, k2, k3, k4 = jax.random.split(key, 5)
        w_ih = jax.random.uniform(k1, (4 * hidden, d_in), jnp.float32, -bound, bound)
        w_hh = jax.random.uniform(k2, (4 * hidden, hidden), jnp.float32, -bound, bound)
        b_ih = jax.random.uniform(k3, (4 * hidden,), jnp.float32, -bound, bound)
        b_hh = jax.random.uniform(k4, (4 * hidden,), jnp.float32, -bound, bound)
        params["lstm"].append((w_ih, w_hh, b_ih + b_hh))
    params["ln_gamma"] = jnp.ones((hidden,), jnp.float32)
    params["ln_beta"] = jnp.zeros((hidden,), jnp.float32)
    key, k5, k6 = jax.random.split(key, 3)
    params["lin_w"] = jax.random.uniform(k5, (OUT_DIM, hidden), jnp.float32,
                                         -bound, bound)
    params["lin_b"] = jax.random.uniform(k6, (OUT_DIM,), jnp.float32, -bound, bound)
    return params


# ----------------------------------------------------------------------------
# One-time parameter packing (outside the per-call path): transpose, g-gate
# scale (single-sigmoid trick), fold LayerNorm into the head, pad to 128 lanes,
# pre-cast MXU operands to bf16.
# ----------------------------------------------------------------------------
def pack_params(params):
    H, Din, O = HIDDEN, INPUT_DIM, OUT_DIM
    (w_ih0, w_hh0, b0), (w_ih1, w_hh1, b1) = params["lstm"]

    def scale_g(a):            # x2 on the g-gate block (indices 2H:3H of last dim)
        return a.at[..., 2 * H:3 * H].multiply(2.0)

    wih0_t = scale_g(w_ih0.T)      # (Din, 4H)
    whh0_t = scale_g(w_hh0.T)      # (H, 4H)
    wih1_t = scale_g(w_ih1.T)      # (H, 4H)
    whh1_t = scale_g(w_hh1.T)      # (H, 4H)
    b0s = scale_g(b0)              # (4H,)
    b1s = scale_g(b1)              # (4H,)

    # Wavefront block weight (2H, 8H), kept f32 (recurrent-path accuracy):
    #   [ W_hh0^T   W_ih1^T ]
    #   [    0      W_hh1^T ]
    w_wave = jnp.concatenate(
        [jnp.concatenate([whh0_t, wih1_t], axis=1),
         jnp.concatenate([jnp.zeros((H, 4 * H), jnp.float32), whh1_t], axis=1)],
        axis=0)

    # Head with LayerNorm affine folded in, padded to 128 output lanes:
    #   out = norm(y) @ (diag(gamma) @ W_lin^T) + (beta @ W_lin^T + b_lin)
    gamma, beta = params["ln_gamma"], params["ln_beta"]
    w_lin, b_lin = params["lin_w"], params["lin_b"]              # (O, H), (O,)
    w_head = (w_lin * gamma[None, :]).T                          # (H, O)
    b_head = beta @ w_lin.T + b_lin                              # (O,)
    w_head_p = jnp.zeros((H, LANE), jnp.float32).at[:, :O].set(w_head)
    b_head_p = jnp.zeros((LANE,), jnp.float32).at[:O].set(b_head)

    # bf16 weight slab (Din+H, 8H): rows 0:Din = [W_ih0^T | 0],
    # rows Din:Din+H = [W_head_padded | 0].
    w_in_row = jnp.concatenate([wih0_t, jnp.zeros((Din, 4 * H), jnp.float32)], axis=1)
    w_head_row = jnp.concatenate(
        [w_head_p, jnp.zeros((H, 8 * H - LANE), jnp.float32)], axis=1)
    w_slab = jnp.concatenate([w_in_row, w_head_row], axis=0).astype(MXU_DTYPE)

    # f32 bias slab (2, 8H): row 0 = [b0 | b1], row 1 = [b_head_padded | 0].
    b_slab = jnp.stack(
        [jnp.concatenate([b0s, b1s]),
         jnp.concatenate([b_head_p, jnp.zeros((8 * H - LANE,), jnp.float32)])])

    return {"w_slab": w_slab, "w_wave": w_wave, "b_slab": b_slab}


# ----------------------------------------------------------------------------
# Full forward pass == LSTM_fixed.forwardold (eval mode).
# ----------------------------------------------------------------------------
def lstm_fixed_forward(packed, x_btd, h0_lbh, c0_lbh):
    """x_btd: (B, T, input_dim) batch_first; h0/c0: (num_layers, B, H).
    Returns (out (B, T, 2), (h (L, B, H), c (L, B, H)))."""
    B, T, Din = x_btd.shape
    L, _, H = h0_lbh.shape
    O = OUT_DIM
    rows = B * T + 2 * L * B

    x_tbd = jnp.transpose(x_btd, (1, 0, 2)).astype(jnp.float32)  # feed time-major

    slab = pl.pallas_call(
        _fused_lstm_kernel,
        out_shape=jax.ShapeDtypeStruct((rows, LANE), jnp.float32),
        grid_spec=pltpu.PrefetchScalarGridSpec(
            num_scalar_prefetch=0,
            grid=(1,),
            in_specs=[
                pl.BlockSpec((T, B, Din), lambda i: (0, 0, 0)),           # x (T-major)
                pl.BlockSpec((L, B, H), lambda i: (0, 0, 0)),             # h0
                pl.BlockSpec((L, B, H), lambda i: (0, 0, 0)),             # c0
                pl.BlockSpec(packed["w_slab"].shape, lambda i: (0, 0)),   # bf16 weights
                pl.BlockSpec(packed["w_wave"].shape, lambda i: (0, 0)),   # f32 wavefront
                pl.BlockSpec(packed["b_slab"].shape, lambda i: (0, 0)),   # f32 biases
            ],
            out_specs=pl.BlockSpec((rows, LANE), lambda i: (0, 0)),
        ),
        compiler_params=pltpu.CompilerParams(
            dimension_semantics=("arbitrary",)),
    )(x_tbd, h0_lbh.astype(jnp.float32), c0_lbh.astype(jnp.float32),
      packed["w_slab"], packed["w_wave"], packed["b_slab"])

    out = slab[:B * T, :O].reshape(B, T, O)
    h = slab[B * T:B * T + L * B, :H].reshape(L, B, H)
    c = slab[B * T + L * B:, :H].reshape(L, B, H)
    return out, (h, c)


# ----------------------------------------------------------------------------
# Pure-JAX f32 reference (mirrors PyTorch nn.LSTM / LayerNorm / Linear, eval).
# ----------------------------------------------------------------------------
def reference_forward(params, x, h0, c0):
    B, T, _ = x.shape
    (w_ih0, w_hh0, b0), (w_ih1, w_hh1, b1) = params["lstm"]

    def cell(x_t, h, c, w_ih, w_hh, b):
        gates = x_t @ w_ih.T + h @ w_hh.T + b
        i, f, g, o = jnp.split(gates, 4, axis=-1)
        i = jax.nn.sigmoid(i)
        f = jax.nn.sigmoid(f)
        g = jnp.tanh(g)
        o = jax.nn.sigmoid(o)
        c = f * c + i * g
        h = o * jnp.tanh(c)
        return h, c

    h0_, c0_ = h0[0], c0[0]
    h1_, c1_ = h0[1], c0[1]
    ys = []
    for t in range(T):
        h0_, c0_ = cell(x[:, t], h0_, c0_, w_ih0, w_hh0, b0)
        h1_, c1_ = cell(h0_, h1_, c1_, w_ih1, w_hh1, b1)
        ys.append(h1_)
    y = jnp.stack(ys, axis=1)                                    # (B, T, H)
    mean = y.mean(-1, keepdims=True)
    var = ((y - mean) ** 2).mean(-1, keepdims=True)
    yn = (y - mean) / jnp.sqrt(var + 1e-5) * params["ln_gamma"] + params["ln_beta"]
    out = yn @ params["lin_w"].T + params["lin_b"]
    return out, (jnp.stack([h0_, h1_], 0), jnp.stack([c0_, c1_], 0))


if __name__ == "__main__":
    key = jax.random.PRNGKey(0)
    pkey, xkey = jax.random.split(key)
    params = init_params(pkey, INPUT_DIM, HIDDEN, NUM_LAYERS)
    packed = pack_params(params)             # one-time packing, outside the call path

    x = jax.random.normal(xkey, (BATCH, SEQ, INPUT_DIM), jnp.float32)
    # init_hidden: zeros, shape (num_layers, batch, hidden)
    h0 = jnp.zeros((NUM_LAYERS, BATCH, HIDDEN), jnp.float32)
    c0 = jnp.zeros((NUM_LAYERS, BATCH, HIDDEN), jnp.float32)

    fwd = jax.jit(lstm_fixed_forward)
    out, (h, c) = fwd(packed, x, h0, c0)
    jax.block_until_ready((out, h, c))

    ref_out, (ref_h, ref_c) = reference_forward(params, x, h0, c0)

    assert out.shape == (BATCH, SEQ, OUT_DIM)
    assert h.shape == (NUM_LAYERS, BATCH, HIDDEN)
    assert c.shape == (NUM_LAYERS, BATCH, HIDDEN)
    assert bool(jnp.all(jnp.isfinite(out)))
    assert bool(jnp.allclose(out, ref_out, rtol=5e-2, atol=5e-2))
    assert bool(jnp.allclose(h, ref_h, rtol=5e-2, atol=5e-2))
    assert bool(jnp.allclose(c, ref_c, rtol=5e-2, atol=5e-2))
    print("KERNEL_OK")
</pallas_src>

<mosaic_0001>
module attributes {stable_mosaic.version = 11 : i64} {
  func.func @_fused_lstm_kernel(%arg0: i32, %arg1: memref<8x2x16xf32, #tpu.memory_space<vmem>>, %arg2: memref<2x2x32xf32, #tpu.memory_space<vmem>>, %arg3: memref<2x2x32xf32, #tpu.memory_space<vmem>>, %arg4: memref<48x256xbf16, #tpu.memory_space<vmem>>, %arg5: memref<64x256xf32, #tpu.memory_space<vmem>>, %arg6: memref<2x256xf32, #tpu.memory_space<vmem>>, %arg7: memref<24x128xf32, #tpu.memory_space<vmem>>) attributes {dimension_semantics = [#tpu.dimension_semantics<arbitrary>], iteration_bounds = array<i64: 1>, scalar_prefetch = 0 : i64, scratch_operands = 0 : i64, tpu.core_type = #tpu.core_type<tc>, window_params = [{pipeline_mode = #tpu.pipeline_mode<synchronous>, transform_indices = @transform_0, window_bounds = array<i64: 8, 2, 16>}, {pipeline_mode = #tpu.pipeline_mode<synchronous>, transform_indices = @transform_1, window_bounds = array<i64: 2, 2, 32>}, {pipeline_mode = #tpu.pipeline_mode<synchronous>, transform_indices = @transform_2, window_bounds = array<i64: 2, 2, 32>}, {pipeline_mode = #tpu.pipeline_mode<synchronous>, transform_indices = @transform_3, window_bounds = array<i64: 48, 256>}, {pipeline_mode = #tpu.pipeline_mode<synchronous>, transform_indices = @transform_4, window_bounds = array<i64: 64, 256>}, {pipeline_mode = #tpu.pipeline_mode<synchronous>, transform_indices = @transform_5, window_bounds = array<i64: 2, 256>}, {pipeline_mode = #tpu.pipeline_mode<synchronous>, transform_indices = @transform_6, window_bounds = array<i64: 24, 128>}]} {
    %c0 = arith.constant 0 : index
    %c0_0 = arith.constant 0 : index
    %0 = vector.load %arg4[%c0, %c0_0] : memref<48x256xbf16, #tpu.memory_space<vmem>>, vector<16x256xbf16>
    %c16 = arith.constant 16 : index
    %c0_1 = arith.constant 0 : index
    %1 = vector.load %arg4[%c16, %c0_1] : memref<48x256xbf16, #tpu.memory_space<vmem>>, vector<32x128xbf16>
    %c0_2 = arith.constant 0 : index
    %c0_3 = arith.constant 0 : index
    %2 = vector.load %arg5[%c0_2, %c0_3] : memref<64x256xf32, #tpu.memory_space<vmem>>, vector<64x256xf32>
    %c0_4 = arith.constant 0 : index
    %c0_5 = arith.constant 0 : index
    %3 = vector.load %arg6[%c0_4, %c0_5] : memref<2x256xf32, #tpu.memory_space<vmem>>, vector<1x256xf32>
    %c1 = arith.constant 1 : index
    %c0_6 = arith.constant 0 : index
    %4 = vector.load %arg6[%c1, %c0_6] : memref<2x256xf32, #tpu.memory_space<vmem>>, vector<1x128xf32>
    %c0_7 = arith.constant 0 : index
    %c0_8 = arith.constant 0 : index
    %c0_9 = arith.constant 0 : index
    %5 = vector.load %arg1[%c0_7, %c0_8, %c0_9] : memref<8x2x16xf32, #tpu.memory_space<vmem>>, vector<8x2x16xf32>
    %6 = vector.shape_cast %5 : vector<8x2x16xf32> to vector<16x16xf32>
    %7 = arith.truncf %6 : vector<16x16xf32> to vector<16x16xbf16>
    %cst = arith.constant dense<0.000000e+00> : vector<16x256xf32>
    %8 = tpu.matmul %7, %0, %cst {dimension_numbers = #tpu.dot_dimension_numbers<[1], [0], [0], [1], [0, 0, 1, 1], [], []>} : vector<16x16xbf16>, vector<16x256xbf16>, vector<16x256xf32> -> vector<16x256xf32>
    %9 = vector.broadcast %3 : vector<1x256xf32> to vector<16x256xf32>
    %10 = arith.addf %8, %9 : vector<16x256xf32>
    %11 = vector.shape_cast %10 : vector<16x256xf32> to vector<8x2x256xf32>
    %c0_10 = arith.constant 0 : index
    %c0_11 = arith.constant 0 : index
    %c0_12 = arith.constant 0 : index
    %12 = vector.load %arg2[%c0_10, %c0_11, %c0_12] : memref<2x2x32xf32, #tpu.memory_space<vmem>>, vector<1x2x32xf32>
    %13 = vector.shape_cast %12 : vector<1x2x32xf32> to vector<2x32xf32>
    %c0_13 = arith.constant 0 : index
    %c0_14 = arith.constant 0 : index
    %c0_15 = arith.constant 0 : index
    %14 = vector.load %arg3[%c0_13, %c0_14, %c0_15] : memref<2x2x32xf32, #tpu.memory_space<vmem>>, vector<1x2x32xf32>
    %15 = vector.shape_cast %14 : vector<1x2x32xf32> to vector<2x32xf32>
    %c1_16 = arith.constant 1 : index
    %c0_17 = arith.constant 0 : index
    %c0_18 = arith.constant 0 : index
    %16 = vector.load %arg2[%c1_16, %c0_17, %c0_18] : memref<2x2x32xf32, #tpu.memory_space<vmem>>, vector<1x2x32xf32>
    %17 = vector.shape_cast %16 : vector<1x2x32xf32> to vector<2x32xf32>
    %c1_19 = arith.constant 1 : index
    %c0_20 = arith.constant 0 : index
    %c0_21 = arith.constant 0 : index
    %18 = vector.load %arg3[%c1_19, %c0_20, %c0_21] : memref<2x2x32xf32, #tpu.memory_space<vmem>>, vector<1x2x32xf32>
    %19 = vector.shape_cast %18 : vector<1x2x32xf32> to vector<2x32xf32>
    %20 = tpu.concatenate %13, %17 in 1 : vector<2x32xf32>, vector<2x32xf32> -> vector<2x64xf32>
    %cst_22 = arith.constant dense<0.000000e+00> : vector<2x256xf32>
    %21 = tpu.matmul %20, %2, %cst_22 {dimension_numbers = #tpu.dot_dimension_numbers<[1], [0], [0], [1], [0, 0, 1, 1], [], []>} : vector<2x64xf32>, vector<64x256xf32>, vector<2x256xf32> -> vector<2x256xf32>
    %22 = vector.extract_strided_slice %11 {offsets = [0, 0, 0], sizes = [1, 2, 256], strides = [1, 1, 1]} : vector<8x2x256xf32> to vector<1x2x256xf32>
    %23 = vector.shape_cast %22 : vector<1x2x256xf32> to vector<2x256xf32>
    %24 = arith.addf %21, %23 : vector<2x256xf32>
    %25 = arith.negf %24 : vector<2x256xf32>
    %26 = math.exp %25 : vector<2x256xf32>
    %cst_23 = arith.constant 1.000000e+00 : f32
    %27 = vector.broadcast %cst_23 : f32 to vector<2x256xf32>
    %28 = arith.addf %27, %26 : vector<2x256xf32>
    %29 = arith.divf %27, %28 : vector<2x256xf32>
    %30 = vector.extract_strided_slice %29 {offsets = [0, 0], sizes = [2, 32], strides = [1, 1]} : vector<2x256xf32> to vector<2x32xf32>
    %31 = vector.extract_strided_slice %29 {offsets = [0, 32], sizes = [2, 32], strides = [1, 1]} : vector<2x256xf32> to vector<2x32xf32>
    %32 = vector.extract_strided_slice %29 {offsets = [0, 64], sizes = [2, 32], strides = [1, 1]} : vector<2x256xf32> to vector<2x32xf32>
    %cst_24 = arith.constant 2.000000e+00 : f32
    %33 = vector.broadcast %cst_24 : f32 to vector<2x32xf32>
    %34 = arith.mulf %33, %32 : vector<2x32xf32>
    %cst_25 = arith.constant 1.000000e+00 : f32
    %35 = vector.broadcast %cst_25 : f32 to vector<2x32xf32>
    %36 = arith.subf %34, %35 : vector<2x32xf32>
    %37 = vector.extract_strided_slice %29 {offsets = [0, 96], sizes = [2, 32], strides = [1, 1]} : vector<2x256xf32> to vector<2x32xf32>
    %38 = arith.mulf %31, %15 : vector<2x32xf32>
    %39 = arith.mulf %30, %36 : vector<2x32xf32>
    %40 = arith.addf %38, %39 : vector<2x32xf32>
    %41 = math.tanh %40 : vector<2x32xf32>
    %42 = arith.mulf %37, %41 : vector<2x32xf32>
    %43 = tpu.concatenate %42, %17 in 1 : vector<2x32xf32>, vector<2x32xf32> -> vector<2x64xf32>
    %cst_26 = arith.constant dense<0.000000e+00> : vector<2x256xf32>
    %44 = tpu.matmul %43, %2, %cst_26 {dimension_numbers = #tpu.dot_dimension_numbers<[1], [0], [0], [1], [0, 0, 1, 1], [], []>} : vector<2x64xf32>, vector<64x256xf32>, vector<2x256xf32> -> vector<2x256xf32>
    %45 = vector.extract_strided_slice %11 {offsets = [1, 0, 0], sizes = [1, 2, 256], strides = [1, 1, 1]} : vector<8x2x256xf32> to vector<1x2x256xf32>
    %46 = vector.shape_cast %45 : vector<1x2x256xf32> to vector<2x256xf32>
    %47 = arith.addf %44, %46 : vector<2x256xf32>
    %48 = arith.negf %47 : vector<2x256xf32>
    %49 = math.exp %48 : vector<2x256xf32>
    %cst_27 = arith.constant 1.000000e+00 : f32
    %50 = vector.broadcast %cst_27 : f32 to vector<2x256xf32>
    %51 = arith.addf %50, %49 : vector<2x256xf32>
    %52 = arith.divf %50, %51 : vector<2x256xf32>
    %53 = vector.extract_strided_slice %52 {offsets = [0, 128], sizes = [2, 32], strides = [1, 1]} : vector<2x256xf32> to vector<2x32xf32>
    %54 = vector.extract_strided_slice %52 {offsets = [0, 160], sizes = [2, 32], strides = [1, 1]} : vector<2x256xf32> to vector<2x32xf32>
    %55 = vector.extract_strided_slice %52 {offsets = [0, 192], sizes = [2, 32], strides = [1, 1]} : vector<2x256xf32> to vector<2x32xf32>
    %cst_28 = arith.constant 2.000000e+00 : f32
    %56 = vector.broadcast %cst_28 : f32 to vector<2x32xf32>
    %57 = arith.mulf %56, %55 : vector<2x32xf32>
    %cst_29 = arith.constant 1.000000e+00 : f32
    %58 = vector.broadcast %cst_29 : f32 to vector<2x32xf32>
    %59 = arith.subf %57, %58 : vector<2x32xf32>
    %60 = vector.extract_strided_slice %52 {offsets = [0, 224], sizes = [2, 32], strides = [1, 1]} : vector<2x256xf32> to vector<2x32xf32>
    %61 = arith.mulf %54, %19 : vector<2x32xf32>
    %62 = arith.mulf %53, %59 : vector<2x32xf32>
    %63 = arith.addf %61, %62 : vector<2x32xf32>
    %64 = math.tanh %63 : vector<2x32xf32>
    %65 = arith.mulf %60, %64 : vector<2x32xf32>
    %66 = vector.extract_strided_slice %52 {offsets = [0, 0], sizes = [2, 32], strides = [1, 1]} : vector<2x256xf32> to vector<2x32xf32>
    %67 = vector.extract_strided_slice %52 {offsets = [0, 32], sizes = [2, 32], strides = [1, 1]} : vector<2x256xf32> to vector<2x32xf32>
    %68 = vector.extract_strided_slice %52 {offsets = [0, 64], sizes = [2, 32], strides = [1, 1]} : vector<2x256xf32> to vector<2x32xf32>
    %cst_30 = arith.constant 2.000000e+00 : f32
    %69 = vector.broadcast %cst_30 : f32 to vector<2x32xf32>
    %70 = arith.mulf %69, %68 : vector<2x32xf32>
    %cst_31 = arith.constant 1.000000e+00 : f32
    %71 = vector.broadcast %cst_31 : f32 to vector<2x32xf32>
    %72 = arith.subf %70, %71 : vector<2x32xf32>
    %73 = vector.extract_strided_slice %52 {offsets = [0, 96], sizes = [2, 32], strides = [1, 1]} : vector<2x256xf32> to vector<2x32xf32>
    %74 = arith.mulf %67, %40 : vector<2x32xf32>
    %75 = arith.mulf %66, %72 : vector<2x32xf32>
    %76 = arith.addf %74, %75 : vector<2x32xf32>
    %77 = math.tanh %76 : vector<2x32xf32>
    %78 = arith.mulf %73, %77 : vector<2x32xf32>
    %79 = tpu.concatenate %78, %65 in 1 : vector<2x32xf32>, vector<2x32xf32> -> vector<2x64xf32>
    %cst_32 = arith.constant dense<0.000000e+00> : vector<2x256xf32>
    %80 = tpu.matmul %79, %2, %cst_32 {dimension_numbers = #tpu.dot_dimension_numbers<[1], [0], [0], [1], [0, 0, 1, 1], [], []>} : vector<2x64xf32>, vector<64x256xf32>, vector<2x256xf32> -> vector<2x256xf32>
    %81 = vector.extract_strided_slice %11 {offsets = [2, 0, 0], sizes = [1, 2, 256], strides = [1, 1, 1]} : vector<8x2x256xf32> to vector<1x2x256xf32>
    %82 = vector.shape_cast %81 : vector<1x2x256xf32> to vector<2x256xf32>
    %83 = arith.addf %80, %82 : vector<2x256xf32>
    %84 = arith.negf %83 : vector<2x256xf32>
    %85 = math.exp %84 : vector<2x256xf32>
    %cst_33 = arith.constant 1.000000e+00 : f32
    %86 = vector.broadcast %cst_33 : f32 to vector<2x256xf32>
    %87 = arith.addf %86, %85 : vector<2x256xf32>
    %88 = arith.divf %86, %87 : vector<2x256xf32>
    %89 = vector.extract_strided_slice %88 {offsets = [0, 128], sizes = [2, 32], strides = [1, 1]} : vector<2x256xf32> to vector<2x32xf32>
    %90 = vector.extract_strided_slice %88 {offsets = [0, 160], sizes = [2, 32], strides = [1, 1]} : vector<2x256xf32> to vector<2x32xf32>
    %91 = vector.extract_strided_slice %88 {offsets = [0, 192], sizes = [2, 32], strides = [1, 1]} : vector<2x256xf32> to vector<2x32xf32>
    %cst_34 = arith.constant 2.000000e+00 : f32
    %92 = vector.broadcast %cst_34 : f32 to vector<2x32xf32>
    %93 = arith.mulf %92, %91 : vector<2x32xf32>
    %cst_35 = arith.constant 1.000000e+00 : f32
    %94 = vector.broadcast %cst_35 : f32 to vector<2x32xf32>
    %95 = arith.subf %93, %94 : vector<2x32xf32>
    %96 = vector.extract_strided_slice %88 {offsets = [0, 224], sizes = [2, 32], strides = [1, 1]} : vector<2x256xf32> to vector<2x32xf32>
    %97 = arith.mulf %90, %63 : vector<2x32xf32>
    %98 = arith.mulf %89, %95 : vector<2x32xf32>
    %99 = arith.addf %97, %98 : vector<2x32xf32>
    %100 = math.tanh %99 : vector<2x32xf32>
    %101 = arith.mulf %96, %100 : vector<2x32xf32>
    %102 = vector.extract_strided_slice %88 {offsets = [0, 0], sizes = [2, 32], strides = [1, 1]} : vector<2x256xf32> to vector<2x32xf32>
    %103 = vector.extract_strided_slice %88 {offsets = [0, 32], sizes = [2, 32], strides = [1, 1]} : vector<2x256xf32> to vector<2x32xf32>
    %104 = vector.extract_strided_slice %88 {offsets = [0, 64], sizes = [2, 32], strides = [1, 1]} : vector<2x256xf32> to vector<2x32xf32>
    %cst_36 = arith.constant 2.000000e+00 : f32
    %105 = vector.broadcast %cst_36 : f32 to vector<2x32xf32>
    %106 = arith.mulf %105, %104 : vector<2x32xf32>
    %cst_37 = arith.constant 1.000000e+00 : f32
    %107 = vector.broadcast %cst_37 : f32 to vector<2x32xf32>
    %108 = arith.subf %106, %107 : vector<2x32xf32>
    %109 = vector.extract_strided_slice %88 {offsets = [0, 96], sizes = [2, 32], strides = [1, 1]} : vector<2x256xf32> to vector<2x32xf32>
    %110 = arith.mulf %103, %76 : vector<2x32xf32>
    %111 = arith.mulf %102, %108 : vector<2x32xf32>
    %112 = arith.addf %110, %111 : vector<2x32xf32>
    %113 = math.tanh %112 : vector<2x32xf32>
    %114 = arith.mulf %109, %113 : vector<2x32xf32>
    %115 = tpu.concatenate %114, %101 in 1 : vector<2x32xf32>, vector<2x32xf32> -> vector<2x64xf32>
    %cst_38 = arith.constant dense<0.000000e+00> : vector<2x256xf32>
    %116 = tpu.matmul %115, %2, %cst_38 {dimension_numbers = #tpu.dot_dimension_numbers<[1], [0], [0], [1], [0, 0, 1, 1], [], []>} : vector<2x64xf32>, vector<64x256xf32>, vector<2x256xf32> -> vector<2x256xf32>
    %117 = vector.extract_strided_slice %11 {offsets = [3, 0, 0], sizes = [1, 2, 256], strides = [1, 1, 1]} : vector<8x2x256xf32> to vector<1x2x256xf32>
    %118 = vector.shape_cast %117 : vector<1x2x256xf32> to vector<2x256xf32>
    %119 = arith.addf %116, %118 : vector<2x256xf32>
    %120 = arith.negf %119 : vector<2x256xf32>
    %121 = math.exp %120 : vector<2x256xf32>
    %cst_39 = arith.constant 1.000000e+00 : f32
    %122 = vector.broadcast %cst_39 : f32 to vector<2x256xf32>
    %123 = arith.addf %122, %121 : vector<2x256xf32>
    %124 = arith.divf %122, %123 : vector<2x256xf32>
    %125 = vector.extract_strided_slice %124 {offsets = [0, 128], sizes = [2, 32], strides = [1, 1]} : vector<2x256xf32> to vector<2x32xf32>
    %126 = vector.extract_strided_slice %124 {offsets = [0, 160], sizes = [2, 32], strides = [1, 1]} : vector<2x256xf32> to vector<2x32xf32>
    %127 = vector.extract_strided_slice %124 {offsets = [0, 192], sizes = [2, 32], strides = [1, 1]} : vector<2x256xf32> to vector<2x32xf32>
    %cst_40 = arith.constant 2.000000e+00 : f32
    %128 = vector.broadcast %cst_40 : f32 to vector<2x32xf32>
    %129 = arith.mulf %128, %127 : vector<2x32xf32>
    %cst_41 = arith.constant 1.000000e+00 : f32
    %130 = vector.broadcast %cst_41 : f32 to vector<2x32xf32>
    %131 = arith.subf %129, %130 : vector<2x32xf32>
    %132 = vector.extract_strided_slice %124 {offsets = [0, 224], sizes = [2, 32], strides = [1, 1]} : vector<2x256xf32> to vector<2x32xf32>
    %133 = arith.mulf %126, %99 : vector<2x32xf32>
    %134 = arith.mulf %125, %131 : vector<2x32xf32>
    %135 = arith.addf %133, %134 : vector<2x32xf32>
    %136 = math.tanh %135 : vector<2x32xf32>
    %137 = arith.mulf %132, %136 : vector<2x32xf32>
    %138 = vector.extract_strided_slice %124 {offsets = [0, 0], sizes = [2, 32], strides = [1, 1]} : vector<2x256xf32> to vector<2x32xf32>
    %139 = vector.extract_strided_slice %124 {offsets = [0, 32], sizes = [2, 32], strides = [1, 1]} : vector<2x256xf32> to vector<2x32xf32>
    %140 = vector.extract_strided_slice %124 {offsets = [0, 64], sizes = [2, 32], strides = [1, 1]} : vector<2x256xf32> to vector<2x32xf32>
    %cst_42 = arith.constant 2.000000e+00 : f32
    %141 = vector.broadcast %cst_42 : f32 to vector<2x32xf32>
    %142 = arith.mulf %141, %140 : vector<2x32xf32>
    %cst_43 = arith.constant 1.000000e+00 : f32
    %143 = vector.broadcast %cst_43 : f32 to vector<2x32xf32>
    %144 = arith.subf %142, %143 : vector<2x32xf32>
    %145 = vector.extract_strided_slice %124 {offsets = [0, 96], sizes = [2, 32], strides = [1, 1]} : vector<2x256xf32> to vector<2x32xf32>
    %146 = arith.mulf %139, %112 : vector<2x32xf32>
    %147 = arith.mulf %138, %144 : vector<2x32xf32>
    %148 = arith.addf %146, %147 : vector<2x32xf32>
    %149 = math.tanh %148 : vector<2x32xf32>
    %150 = arith.mulf %145, %149 : vector<2x32xf32>
    %151 = tpu.concatenate %150, %137 in 1 : vector<2x32xf32>, vector<2x32xf32> -> vector<2x64xf32>
    %cst_44 = arith.constant dense<0.000000e+00> : vector<2x256xf32>
    %152 = tpu.matmul %151, %2, %cst_44 {dimension_numbers = #tpu.dot_dimension_numbers<[1], [0], [0], [1], [0, 0, 1, 1], [], []>} : vector<2x64xf32>, vector<64x256xf32>, vector<2x256xf32> -> vector<2x256xf32>
    %153 = vector.extract_strided_slice %11 {offsets = [4, 0, 0], sizes = [1, 2, 256], strides = [1, 1, 1]} : vector<8x2x256xf32> to vector<1x2x256xf32>
    %154 = vector.shape_cast %153 : vector<1x2x256xf32> to vector<2x256xf32>
    %155 = arith.addf %152, %154 : vector<2x256xf32>
    %156 = arith.negf %155 : vector<2x256xf32>
    %157 = math.exp %156 : vector<2x256xf32>
    %cst_45 = arith.constant 1.000000e+00 : f32
    %158 = vector.broadcast %cst_45 : f32 to vector<2x256xf32>
    %159 = arith.addf %158, %157 : vector<2x256xf32>
    %160 = arith.divf %158, %159 : vector<2x256xf32>
    %161 = vector.extract_strided_slice %160 {offsets = [0, 128], sizes = [2, 32], strides = [1, 1]} : vector<2x256xf32> to vector<2x32xf32>
    %162 = vector.extract_strided_slice %160 {offsets = [0, 160], sizes = [2, 32], strides = [1, 1]} : vector<2x256xf32> to vector<2x32xf32>
    %163 = vector.extract_strided_slice %160 {offsets = [0, 192], sizes = [2, 32], strides = [1, 1]} : vector<2x256xf32> to vector<2x32xf32>
    %cst_46 = arith.constant 2.000000e+00 : f32
    %164 = vector.broadcast %cst_46 : f32 to vector<2x32xf32>
    %165 = arith.mulf %164, %163 : vector<2x32xf32>
    %cst_47 = arith.constant 1.000000e+00 : f32
    %166 = vector.broadcast %cst_47 : f32 to vector<2x32xf32>
    %167 = arith.subf %165, %166 : vector<2x32xf32>
    %168 = vector.extract_strided_slice %160 {offsets = [0, 224], sizes = [2, 32], strides = [1, 1]} : vector<2x256xf32> to vector<2x32xf32>
    %169 = arith.mulf %162, %135 : vector<2x32xf32>
    %170 = arith.mulf %161, %167 : vector<2x32xf32>
    %171 = arith.addf %169, %170 : vector<2x32xf32>
    %172 = math.tanh %171 : vector<2x32xf32>
    %173 = arith.mulf %168, %172 : vector<2x32xf32>
    %174 = vector.extract_strided_slice %160 {offsets = [0, 0], sizes = [2, 32], strides = [1, 1]} : vector<2x256xf32> to vector<2x32xf32>
    %175 = vector.extract_strided_slice %160 {offsets = [0, 32], sizes = [2, 32], strides = [1, 1]} : vector<2x256xf32> to vector<2x32xf32>
    %176 = vector.extract_strided_slice %160 {offsets = [0, 64], sizes = [2, 32], strides = [1, 1]} : vector<2x256xf32> to vector<2x32xf32>
    %cst_48 = arith.constant 2.000000e+00 : f32
    %177 = vector.broadcast %cst_48 : f32 to vector<2x32xf32>
    %178 = arith.mulf %177, %176 : vector<2x32xf32>
    %cst_49 = arith.constant 1.000000e+00 : f32
    %179 = vector.broadcast %cst_49 : f32 to vector<2x32xf32>
    %180 = arith.subf %178, %179 : vector<2x32xf32>
    %181 = vector.extract_strided_slice %160 {offsets = [0, 96], sizes = [2, 32], strides = [1, 1]} : vector<2x256xf32> to vector<2x32xf32>
    %182 = arith.mulf %175, %148 : vector<2x32xf32>
    %183 = arith.mulf %174, %180 : vector<2x32xf32>
    %184 = arith.addf %182, %183 : vector<2x32xf32>
    %185 = math.tanh %184 : vector<2x32xf32>
    %186 = arith.mulf %181, %185 : vector<2x32xf32>
    %187 = tpu.concatenate %186, %173 in 1 : vector<2x32xf32>, vector<2x32xf32> -> vector<2x64xf32>
    %cst_50 = arith.constant dense<0.000000e+00> : vector<2x256xf32>
    %188 = tpu.matmul %187, %2, %cst_50 {dimension_numbers = #tpu.dot_dimension_numbers<[1], [0], [0], [1], [0, 0, 1, 1], [], []>} : vector<2x64xf32>, vector<64x256xf32>, vector<2x256xf32> -> vector<2x256xf32>
    %189 = vector.extract_strided_slice %11 {offsets = [5, 0, 0], sizes = [1, 2, 256], strides = [1, 1, 1]} : vector<8x2x256xf32> to vector<1x2x256xf32>
    %190 = vector.shape_cast %189 : vector<1x2x256xf32> to vector<2x256xf32>
    %191 = arith.addf %188, %190 : vector<2x256xf32>
    %192 = arith.negf %191 : vector<2x256xf32>
    %193 = math.exp %192 : vector<2x256xf32>
    %cst_51 = arith.constant 1.000000e+00 : f32
    %194 = vector.broadcast %cst_51 : f32 to vector<2x256xf32>
    %195 = arith.addf %194, %193 : vector<2x256xf32>
    %196 = arith.divf %194, %195 : vector<2x256xf32>
    %197 = vector.extract_strided_slice %196 {offsets = [0, 128], sizes = [2, 32], strides = [1, 1]} : vector<2x256xf32> to vector<2x32xf32>
    %198 = vector.extract_strided_slice %196 {offsets = [0, 160], sizes = [2, 32], strides = [1, 1]} : vector<2x256xf32> to vector<2x32xf32>
    %199 = vector.extract_strided_slice %196 {offsets = [0, 192], sizes = [2, 32], strides = [1, 1]} : vector<2x256xf32> to vector<2x32xf32>
    %cst_52 = arith.constant 2.000000e+00 : f32
    %200 = vector.broadcast %cst_52 : f32 to vector<2x32xf32>
    %201 = arith.mulf %200, %199 : vector<2x32xf32>
    %cst_53 = arith.constant 1.000000e+00 : f32
    %202 = vector.broadcast %cst_53 : f32 to vector<2x32xf32>
    %203 = arith.subf %201, %202 : vector<2x32xf32>
    %204 = vector.extract_strided_slice %196 {offsets = [0, 224], sizes = [2, 32], strides = [1, 1]} : vector<2x256xf32> to vector<2x32xf32>
    %205 = arith.mulf %198, %171 : vector<2x32xf32>
    %206 = arith.mulf %197, %203 : vector<2x32xf32>
    %207 = arith.addf %205, %206 : vector<2x32xf32>
    %208 = math.tanh %207 : vector<2x32xf32>
    %209 = arith.mulf %204, %208 : vector<2x32xf32>
    %210 = vector.extract_strided_slice %196 {offsets = [0, 0], sizes = [2, 32], strides = [1, 1]} : vector<2x256xf32> to vector<2x32xf32>
    %211 = vector.extract_strided_slice %196 {offsets = [0, 32], sizes = [2, 32], strides = [1, 1]} : vector<2x256xf32> to vector<2x32xf32>
    %212 = vector.extract_strided_slice %196 {offsets = [0, 64], sizes = [2, 32], strides = [1, 1]} : vector<2x256xf32> to vector<2x32xf32>
    %cst_54 = arith.constant 2.000000e+00 : f32
    %213 = vector.broadcast %cst_54 : f32 to vector<2x32xf32>
    %214 = arith.mulf %213, %212 : vector<2x32xf32>
    %cst_55 = arith.constant 1.000000e+00 : f32
    %215 = vector.broadcast %cst_55 : f32 to vector<2x32xf32>
    %216 = arith.subf %214, %215 : vector<2x32xf32>
    %217 = vector.extract_strided_slice %196 {offsets = [0, 96], sizes = [2, 32], strides = [1, 1]} : vector<2x256xf32> to vector<2x32xf32>
    %218 = arith.mulf %211, %184 : vector<2x32xf32>
    %219 = arith.mulf %210, %216 : vector<2x32xf32>
    %220 = arith.addf %218, %219 : vector<2x32xf32>
    %221 = math.tanh %220 : vector<2x32xf32>
    %222 = arith.mulf %217, %221 : vector<2x32xf32>
    %223 = tpu.concatenate %222, %209 in 1 : vector<2x32xf32>, vector<2x32xf32> -> vector<2x64xf32>
    %cst_56 = arith.constant dense<0.000000e+00> : vector<2x256xf32>
    %224 = tpu.matmul %223, %2, %cst_56 {dimension_numbers = #tpu.dot_dimension_numbers<[1], [0], [0], [1], [0, 0, 1, 1], [], []>} : vector<2x64xf32>, vector<64x256xf32>, vector<2x256xf32> -> vector<2x256xf32>
    %225 = vector.extract_strided_slice %11 {offsets = [6, 0, 0], sizes = [1, 2, 256], strides = [1, 1, 1]} : vector<8x2x256xf32> to vector<1x2x256xf32>
    %226 = vector.shape_cast %225 : vector<1x2x256xf32> to vector<2x256xf32>
    %227 = arith.addf %224, %226 : vector<2x256xf32>
    %228 = arith.negf %227 : vector<2x256xf32>
    %229 = math.exp %228 : vector<2x256xf32>
    %cst_57 = arith.constant 1.000000e+00 : f32
    %230 = vector.broadcast %cst_57 : f32 to vector<2x256xf32>
    %231 = arith.addf %230, %229 : vector<2x256xf32>
    %232 = arith.divf %230, %231 : vector<2x256xf32>
    %233 = vector.extract_strided_slice %232 {offsets = [0, 128], sizes = [2, 32], strides = [1, 1]} : vector<2x256xf32> to vector<2x32xf32>
    %234 = vector.extract_strided_slice %232 {offsets = [0, 160], sizes = [2, 32], strides = [1, 1]} : vector<2x256xf32> to vector<2x32xf32>
    %235 = vector.extract_strided_slice %232 {offsets = [0, 192], sizes = [2, 32], strides = [1, 1]} : vector<2x256xf32> to vector<2x32xf32>
    %cst_58 = arith.constant 2.000000e+00 : f32
    %236 = vector.broadcast %cst_58 : f32 to vector<2x32xf32>
    %237 = arith.mulf %236, %235 : vector<2x32xf32>
    %cst_59 = arith.constant 1.000000e+00 : f32
    %238 = vector.broadcast %cst_59 : f32 to vector<2x32xf32>
    %239 = arith.subf %237, %238 : vector<2x32xf32>
    %240 = vector.extract_strided_slice %232 {offsets = [0, 224], sizes = [2, 32], strides = [1, 1]} : vector<2x256xf32> to vector<2x32xf32>
    %241 = arith.mulf %234, %207 : vector<2x32xf32>
    %242 = arith.mulf %233, %239 : vector<2x32xf32>
    %243 = arith.addf %241, %242 : vector<2x32xf32>
    %244 = math.tanh %243 : vector<2x32xf32>
    %245 = arith.mulf %240, %244 : vector<2x32xf32>
    %246 = vector.extract_strided_slice %232 {offsets = [0, 0], sizes = [2, 32], strides = [1, 1]} : vector<2x256xf32> to vector<2x32xf32>
    %247 = vector.extract_strided_slice %232 {offsets = [0, 32], sizes = [2, 32], strides = [1, 1]} : vector<2x256xf32> to vector<2x32xf32>
    %248 = vector.extract_strided_slice %232 {offsets = [0, 64], sizes = [2, 32], strides = [1, 1]} : vector<2x256xf32> to vector<2x32xf32>
    %cst_60 = arith.constant 2.000000e+00 : f32
    %249 = vector.broadcast %cst_60 : f32 to vector<2x32xf32>
    %250 = arith.mulf %249, %248 : vector<2x32xf32>
    %cst_61 = arith.constant 1.000000e+00 : f32
    %251 = vector.broadcast %cst_61 : f32 to vector<2x32xf32>
    %252 = arith.subf %250, %251 : vector<2x32xf32>
    %253 = vector.extract_strided_slice %232 {offsets = [0, 96], sizes = [2, 32], strides = [1, 1]} : vector<2x256xf32> to vector<2x32xf32>
    %254 = arith.mulf %247, %220 : vector<2x32xf32>
    %255 = arith.mulf %246, %252 : vector<2x32xf32>
    %256 = arith.addf %254, %255 : vector<2x32xf32>
    %257 = math.tanh %256 : vector<2x32xf32>
    %258 = arith.mulf %253, %257 : vector<2x32xf32>
    %259 = tpu.concatenate %258, %245 in 1 : vector<2x32xf32>, vector<2x32xf32> -> vector<2x64xf32>
    %cst_62 = arith.constant dense<0.000000e+00> : vector<2x256xf32>
    %260 = tpu.matmul %259, %2, %cst_62 {dimension_numbers = #tpu.dot_dimension_numbers<[1], [0], [0], [1], [0, 0, 1, 1], [], []>} : vector<2x64xf32>, vector<64x256xf32>, vector<2x256xf32> -> vector<2x256xf32>
    %261 = vector.extract_strided_slice %11 {offsets = [7, 0, 0], sizes = [1, 2, 256], strides = [1, 1, 1]} : vector<8x2x256xf32> to vector<1x2x256xf32>
    %262 = vector.shape_cast %261 : vector<1x2x256xf32> to vector<2x256xf32>
    %263 = arith.addf %260, %262 : vector<2x256xf32>
    %264 = arith.negf %263 : vector<2x256xf32>
    %265 = math.exp %264 : vector<2x256xf32>
    %cst_63 = arith.constant 1.000000e+00 : f32
    %266 = vector.broadcast %cst_63 : f32 to vector<2x256xf32>
    %267 = arith.addf %266, %265 : vector<2x256xf32>
    %268 = arith.divf %266, %267 : vector<2x256xf32>
    %269 = vector.extract_strided_slice %268 {offsets = [0, 128], sizes = [2, 32], strides = [1, 1]} : vector<2x256xf32> to vector<2x32xf32>
    %270 = vector.extract_strided_slice %268 {offsets = [0, 160], sizes = [2, 32], strides = [1, 1]} : vector<2x256xf32> to vector<2x32xf32>
    %271 = vector.extract_strided_slice %268 {offsets = [0, 192], sizes = [2, 32], strides = [1, 1]} : vector<2x256xf32> to vector<2x32xf32>
    %cst_64 = arith.constant 2.000000e+00 : f32
    %272 = vector.broadcast %cst_64 : f32 to vector<2x32xf32>
    %273 = arith.mulf %272, %271 : vector<2x32xf32>
    %cst_65 = arith.constant 1.000000e+00 : f32
    %274 = vector.broadcast %cst_65 : f32 to vector<2x32xf32>
    %275 = arith.subf %273, %274 : vector<2x32xf32>
    %276 = vector.extract_strided_slice %268 {offsets = [0, 224], sizes = [2, 32], strides = [1, 1]} : vector<2x256xf32> to vector<2x32xf32>
    %277 = arith.mulf %270, %243 : vector<2x32xf32>
    %278 = arith.mulf %269, %275 : vector<2x32xf32>
    %279 = arith.addf %277, %278 : vector<2x32xf32>
    %280 = math.tanh %279 : vector<2x32xf32>
    %281 = arith.mulf %276, %280 : vector<2x32xf32>
    %282 = vector.extract_strided_slice %268 {offsets = [0, 0], sizes = [2, 32], strides = [1, 1]} : vector<2x256xf32> to vector<2x32xf32>
    %283 = vector.extract_strided_slice %268 {offsets = [0, 32], sizes = [2, 32], strides = [1, 1]} : vector<2x256xf32> to vector<2x32xf32>
    %284 = vector.extract_strided_slice %268 {offsets = [0, 64], sizes = [2, 32], strides = [1, 1]} : vector<2x256xf32> to vector<2x32xf32>
    %cst_66 = arith.constant 2.000000e+00 : f32
    %285 = vector.broadcast %cst_66 : f32 to vector<2x32xf32>
    %286 = arith.mulf %285, %284 : vector<2x32xf32>
    %cst_67 = arith.constant 1.000000e+00 : f32
    %287 = vector.broadcast %cst_67 : f32 to vector<2x32xf32>
    %288 = arith.subf %286, %287 : vector<2x32xf32>
    %289 = vector.extract_strided_slice %268 {offsets = [0, 96], sizes = [2, 32], strides = [1, 1]} : vector<2x256xf32> to vector<2x32xf32>
    %290 = arith.mulf %283, %256 : vector<2x32xf32>
    %291 = arith.mulf %282, %288 : vector<2x32xf32>
    %292 = arith.addf %290, %291 : vector<2x32xf32>
    %293 = math.tanh %292 : vector<2x32xf32>
    %294 = arith.mulf %289, %293 : vector<2x32xf32>
    %295 = tpu.concatenate %294, %281 in 1 : vector<2x32xf32>, vector<2x32xf32> -> vector<2x64xf32>
    %cst_68 = arith.constant dense<0.000000e+00> : vector<2x256xf32>
    %296 = tpu.matmul %295, %2, %cst_68 {dimension_numbers = #tpu.dot_dimension_numbers<[1], [0], [0], [1], [0, 0, 1, 1], [], []>} : vector<2x64xf32>, vector<64x256xf32>, vector<2x256xf32> -> vector<2x256xf32>
    %297 = vector.broadcast %3 : vector<1x256xf32> to vector<2x256xf32>
    %298 = arith.addf %296, %297 : vector<2x256xf32>
    %299 = arith.negf %298 : vector<2x256xf32>
    %300 = math.exp %299 : vector<2x256xf32>
    %cst_69 = arith.constant 1.000000e+00 : f32
    %301 = vector.broadcast %cst_69 : f32 to vector<2x256xf32>
    %302 = arith.addf %301, %300 : vector<2x256xf32>
    %303 = arith.divf %301, %302 : vector<2x256xf32>
    %304 = vector.extract_strided_slice %303 {offsets = [0, 128], sizes = [2, 32], strides = [1, 1]} : vector<2x256xf32> to vector<2x32xf32>
    %305 = vector.extract_strided_slice %303 {offsets = [0, 160], sizes = [2, 32], strides = [1, 1]} : vector<2x256xf32> to vector<2x32xf32>
    %306 = vector.extract_strided_slice %303 {offsets = [0, 192], sizes = [2, 32], strides = [1, 1]} : vector<2x256xf32> to vector<2x32xf32>
    %cst_70 = arith.constant 2.000000e+00 : f32
    %307 = vector.broadcast %cst_70 : f32 to vector<2x32xf32>
    %308 = arith.mulf %307, %306 : vector<2x32xf32>
    %cst_71 = arith.constant 1.000000e+00 : f32
    %309 = vector.broadcast %cst_71 : f32 to vector<2x32xf32>
    %310 = arith.subf %308, %309 : vector<2x32xf32>
    %311 = vector.extract_strided_slice %303 {offsets = [0, 224], sizes = [2, 32], strides = [1, 1]} : vector<2x256xf32> to vector<2x32xf32>
    %312 = arith.mulf %305, %279 : vector<2x32xf32>
    %313 = arith.mulf %304, %310 : vector<2x32xf32>
    %314 = arith.addf %312, %313 : vector<2x32xf32>
    %315 = math.tanh %314 : vector<2x32xf32>
    %316 = arith.mulf %311, %315 : vector<2x32xf32>
    %317 = vector.shape_cast %65 : vector<2x32xf32> to vector<2x1x32xf32>
    %318 = vector.shape_cast %101 : vector<2x32xf32> to vector<2x1x32xf32>
    %319 = vector.shape_cast %137 : vector<2x32xf32> to vector<2x1x32xf32>
    %320 = vector.shape_cast %173 : vector<2x32xf32> to vector<2x1x32xf32>
    %321 = vector.shape_cast %209 : vector<2x32xf32> to vector<2x1x32xf32>
    %322 = vector.shape_cast %245 : vector<2x32xf32> to vector<2x1x32xf32>
    %323 = vector.shape_cast %281 : vector<2x32xf32> to vector<2x1x32xf32>
    %324 = vector.shape_cast %316 : vector<2x32xf32> to vector<2x1x32xf32>
    %325 = tpu.concatenate %317, %318, %319, %320, %321, %322, %323, %324 in 1 : vector<2x1x32xf32>, vector<2x1x32xf32>, vector<2x1x32xf32>, vector<2x1x32xf32>, vector<2x1x32xf32>, vector<2x1x32xf32>, vector<2x1x32xf32>, vector<2x1x32xf32> -> vector<2x8x32xf32>
    %326 = vector.shape_cast %325 : vector<2x8x32xf32> to vector<16x32xf32>
    %cst_72 = arith.constant dense<0.000000e+00> : vector<16xf32>
    %327 = vector.multi_reduction <add>, %326, %cst_72 [1] : vector<16x32xf32> to vector<16xf32>
    %328 = vector.shape_cast %327 : vector<16xf32> to vector<16x1xf32>
    %cst_73 = arith.constant 3.200000e+01 : f32
    %329 = vector.broadcast %cst_73 : f32 to vector<16x1xf32>
    %330 = arith.divf %328, %329 : vector<16x1xf32>
    %331 = vector.broadcast %330 : vector<16x1xf32> to vector<16x32xf32>
    %332 = arith.subf %326, %331 : vector<16x32xf32>
    %333 = arith.mulf %332, %332 : vector<16x32xf32>
    %cst_74 = arith.constant dense<0.000000e+00> : vector<16xf32>
    %334 = vector.multi_reduction <add>, %333, %cst_74 [1] : vector<16x32xf32> to vector<16xf32>
    %335 = vector.shape_cast %334 : vector<16xf32> to vector<16x1xf32>
    %cst_75 = arith.constant 3.200000e+01 : f32
    %336 = vector.broadcast %cst_75 : f32 to vector<16x1xf32>
    %337 = arith.divf %335, %336 : vector<16x1xf32>
    %cst_76 = arith.constant 9.99999974E-6 : f32
    %338 = vector.broadcast %cst_76 : f32 to vector<16x1xf32>
    %339 = arith.addf %337, %338 : vector<16x1xf32>
    %340 = math.rsqrt %339 : vector<16x1xf32>
    %341 = vector.broadcast %340 : vector<16x1xf32> to vector<16x32xf32>
    %342 = arith.mulf %332, %341 : vector<16x32xf32>
    %343 = arith.truncf %342 : vector<16x32xf32> to vector<16x32xbf16>
    %cst_77 = arith.constant dense<0.000000e+00> : vector<16x128xf32>
    %344 = tpu.matmul %343, %1, %cst_77 {dimension_numbers = #tpu.dot_dimension_numbers<[1], [0], [0], [1], [0, 0, 1, 1], [], []>} : vector<16x32xbf16>, vector<32x128xbf16>, vector<16x128xf32> -> vector<16x128xf32>
    %345 = vector.broadcast %4 : vector<1x128xf32> to vector<16x128xf32>
    %346 = arith.addf %344, %345 : vector<16x128xf32>
    %347 = tpu.concatenate %294, %316, %292, %314 in 0 : vector<2x32xf32>, vector<2x32xf32>, vector<2x32xf32>, vector<2x32xf32> -> vector<8x32xf32>
    %cst_78 = arith.constant 0.000000e+00 : f32
    %348 = vector.broadcast %cst_78 : f32 to vector<8x96xf32>
    %349 = tpu.concatenate %347, %348 in 1 : vector<8x32xf32>, vector<8x96xf32> -> vector<8x128xf32>
    %350 = tpu.concatenate %346, %349 in 0 : vector<16x128xf32>, vector<8x128xf32> -> vector<24x128xf32>
    %c0_79 = arith.constant 0 : index
    %c0_80 = arith.constant 0 : index
    %351 = vector.load %arg7[%c0_79, %c0_80] : memref<24x128xf32, #tpu.memory_space<vmem>>, vector<24x128xf32>
    tpu.vector_store %arg7[%c0_79, %c0_80], %350 {strides = array<i32>} : memref<24x128xf32, #tpu.memory_space<vmem>>, vector<24x128xf32>,
    return
  }
  func.func @transform_0(%arg0: i32) -> (i32, i32, i32) {
    %c0_i32 = arith.constant 0 : i32
    %c0_i32_0 = arith.constant 0 : i32
    %c0_i32_1 = arith.constant 0 : i32
    %c0_i32_2 = arith.constant 0 : i32
    return %c0_i32, %c0_i32_0, %c0_i32_1 : i32, i32, i32
  }
  func.func @transform_1(%arg0: i32) -> (i32, i32, i32) {
    %c0_i32 = arith.constant 0 : i32
    %c0_i32_0 = arith.constant 0 : i32
    %c0_i32_1 = arith.constant 0 : i32
    %c0_i32_2 = arith.constant 0 : i32
    return %c0_i32, %c0_i32_0, %c0_i32_1 : i32, i32, i32
  }
  func.func @transform_2(%arg0: i32) -> (i32, i32, i32) {
    %c0_i32 = arith.constant 0 : i32
    %c0_i32_0 = arith.constant 0 : i32
    %c0_i32_1 = arith.constant 0 : i32
    %c0_i32_2 = arith.constant 0 : i32
    return %c0_i32, %c0_i32_0, %c0_i32_1 : i32, i32, i32
  }
  func.func @transform_3(%arg0: i32) -> (i32, i32) {
    %c0_i32 = arith.constant 0 : i32
    %c0_i32_0 = arith.constant 0 : i32
    %c0_i32_1 = arith.constant 0 : i32
    return %c0_i32, %c0_i32_0 : i32, i32
  }
  func.func @transform_4(%arg0: i32) -> (i32, i32) {
    %c0_i32 = arith.constant 0 : i32
    %c0_i32_0 = arith.constant 0 : i32
    %c0_i32_1 = arith.constant 0 : i32
    return %c0_i32, %c0_i32_0 : i32, i32
  }
  func.func @transform_5(%arg0: i32) -> (i32, i32) {
    %c0_i32 = arith.constant 0 : i32
    %c0_i32_0 = arith.constant 0 : i32
    %c0_i32_1 = arith.constant 0 : i32
    return %c0_i32, %c0_i32_0 : i32, i32
  }
  func.func @transform_6(%arg0: i32) -> (i32, i32) {
    %c0_i32 = arith.constant 0 : i32
    %c0_i32_0 = arith.constant 0 : i32
    %c0_i32_1 = arith.constant 0 : i32
    return %c0_i32, %c0_i32_0 : i32, i32
  }
}

</mosaic_0001>

<bundles_post_ra>
// kernel: lstm_fixed_forward.1
= control target key start
LH: loop header
LB: loop body
LE: loop exit
PB: predicated region body
PF: predicated region fallthrough
CT: control target
= control target key end

     0   :  { %11 = vsyncpa [#allocation3], 0  ;;  %s2704_s0 = inlined_call_operand.vmem [shape: f32[8,2,16], index: 0, kind: input, shape index: {}]   ;;  %s2705_s1 = inlined_call_operand.vmem [shape: f32[2,2,32], index: 1, kind: input, shape index: {}]   ;;  %s2706_s2 = inlined_call_operand.vmem [shape: f32[2,2,32], index: 2, kind: input, shape index: {}]   ;;  %s2707_s3 = inlined_call_operand.hbm [shape: bf16[48,256], index: 3, kind: input, shape index: {}]   ;;  %s2708_s4 = inlined_call_operand.hbm [shape: f32[64,256], index: 4, kind: input, shape index: {}]   ;;  %s2709_s5 = inlined_call_operand.vmem [shape: f32[2,256], index: 5, kind: input, shape index: {}]   ;;  %s2710_s6 = inlined_call_operand.vmem [shape: f32[24,128], index: 6, kind: output, shape index: {}]  }
   0x1   :  { %12 = vsyncpa [#allocation5], 0  ;;  %s2107_s21 = smov [#allocation2]  }
   0x2   :  { %s24_s22 = sshll.u32 %s2107_s21, 4  ;;  %s25_s22 = int_to_ptr.vmem [resolvable:$true] %s24_s22 }
   0x3   :  { %s2071_s23 = scalar_lea.vmem %s25_s22, 768  ;;  %p2076_p1 = scmp.lt.s32.totalorder %s25_s22, %s25_s22 }
   0x4   :  { %p2072_p0 = scmp.ne.s32.totalorder %s25_s22, %s2071_s23  ;;  %p2077_p2 = scmp.lt.s32.totalorder %s2071_s23, %s2071_s23 }
   0x6   :  { %p2078_p3 = por %p2077_p2, %p2076_p1 }
   0x8   :  { %p2079_p4 = pnand %p2078_p3, %p2072_p0 }
   0xa   :  { %2082 = shalt.err (!%p2079_p4)
}
   0xb   :  { %s2108_s24 = smov 128   ;;  %s2109_s25 = smov 8  }
   0xc   :  { %30 = dma.hbm_to_vmem [thread:$0]  %s2707_s3, 768, %s25_s22, [#allocation3], %s2108_s24, %s2108_s24, %s2109_s25  }
   0xd   :  { %s2110_s28 = smov [#allocation4]  }
   0xe   :  { %s36_s29 = sshll.u32 %s2110_s28, 4  ;;  %s37_s29 = int_to_ptr.vmem [resolvable:$true] %s36_s29 }
   0xf   :  { %s2091_s30 = scalar_lea.vmem %s37_s29, 2048  ;;  %p2096_p6 = scmp.lt.s32.totalorder %s37_s29, %s37_s29 }
  0x10   :  { %p2092_p5 = scmp.ne.s32.totalorder %s37_s29, %s2091_s30  ;;  %p2097_p7 = scmp.lt.s32.totalorder %s2091_s30, %s2091_s30 }
  0x12   :  { %p2098_p8 = por %p2097_p7, %p2096_p6 }
  0x14   :  { %p2099_p9 = pnand %p2098_p8, %p2092_p5 }
  0x16   :  { %2102 = shalt.err (!%p2099_p9)
}
  0x17   :  { %s2111_s7 = smov 256   ;;  %s2112_s8 = smov 16  }
  0x18   :  { %42 = dma.hbm_to_vmem [thread:$0]  %s2708_s4, 2048, %s37_s29, [#allocation5], %s2111_s7, %s2111_s7, %s2112_s8  }
  0x19   :  { %2103 = dma.done.wait [#allocation3], 768  }
  0x1a   :  { %2104 = vsyncadd [#allocation3], 4294966528 }
  0x1b   :  { %2105 = dma.done.wait [#allocation5], 2048  }
  0x1c   :  { %2106 = vsyncadd [#allocation5], 4294965248  ;;  %v97_v0 = vlaneseq  ;;  %v2113_v1 = vmov 0   ;;  %v2114_v2 = vmov 1983009808   ;;  %v2115_v4 = vmov 0.0  }
  0x1d   :  { %186 = vmatprep.mubr.bf16.mxu0 %v2113_v1  ;;  %v95_v3 = vunpack.c.l.s4 %v2114_v2  ;;  %325 = vmatprep.mubr.f32.mxu1 %v2115_v4  ;;  %v1877_v7 = vld [vmem:[%s2705_s1 + $0x2] sm:$0x3]  ;;  %s2116_s4 = smov 32   ;;  %v1948_v8 = vld [vmem:[#allocation2 + $0x4] ss:$8 sps:$4 sm:$0xff]   ;;  %v2202_v27 = vld [vmem:[#allocation4 + $0x68] sm:$0xff] }
  0x1e   :  { %v2162_v6 = vshrl.u32 %v97_v0, 7  ;;  %244 = vrot.lane.b32.xlu0 %v1877_v7, %s2116_s4  ;;  %v1950_v9 = vld [vmem:[#allocation2] ss:$8 sps:$4 sm:$0xff]   ;;  %v78_v13 = vld [vmem:[%s2704_s0 + $0x4] sm:$0x3]  ;;  %168 = vmatprep.subr.bf16.mxu0 %v1948_v8  ;;  %v2204_v28 = vld [vmem:[#allocation4 + $0x60] sm:$0xff] }
  0x1f   :  { %v96_v5 = vunpack.c.0.s8 %v95_v3  ;;  %v76_v10 = vld [vmem:[%s2704_s0] sm:$0x3]  ;;  %v77_v12 = vld [vmem:[%s2704_s0 + $0x2] sm:$0x3]  ;;  %v79_v14 = vld [vmem:[%s2704_s0 + $0x6] sm:$0x3]  ;;  %169 = vmatpush1.bf16.msra.mxu0 %v1950_v9 }
  0x20   :  { %v80_v15 = vld [vmem:[%s2704_s0 + $0x8] sm:$0x3]  ;;  %v81_v16 = vld [vmem:[%s2704_s0 + $0xa] sm:$0x3]  ;;  %v82_v17 = vld [vmem:[%s2704_s0 + $0xc] sm:$0x3]  ;;  %v92_v18 = vcombine.low %v76_v10, %v77_v12  ;;  %v93_v19 = vcombine.low %v78_v13, %v79_v14 }
  0x21   :  { %v2172_v11 = vsub.s32 %v96_v5, %v2162_v6  ;;  %v83_v20 = vld [vmem:[%s2704_s0 + $0xe] sm:$0x3]  ;;  %v109_v21 = vcombine.low %v80_v15, %v81_v16  ;;  %v2197_v23 = vld [vmem:[#allocation4 + $0x70] sm:$0xff]  ;;  %v2216_v34 = vld [vmem:[#allocation4 + $0x48] sm:$0xff]  ;;  %vm150_vm0 = vcmask 130048   ;;  %vm247_vm1 = vcmask 261120  }
  0x22   :  { %v2195_v22 = vld [vmem:[#allocation4 + $0x78] sm:$0xff]  ;;  %v110_v26 = vcombine.low %v82_v17, %v83_v20  ;;  %v2213_v33 = vld [vmem:[#allocation4 + $0x50] sm:$0xff]  ;;  %v2219_v36 = vld [vmem:[#allocation4 + $0x40] sm:$0xff]  ;;  %vm257_vm2 = vcmask 523264   ;;  %v2296_v50 = vsub.s32 0, %v2162_v6  ;;  %v136_v52 = vsub.s32 1, %v2162_v6 }
  0x23   :  { %v100_v24 = vrot.slane %v92_v18, %v2172_v11  ;;  %v107_v25 = vrot.slane %v93_v19, %v2172_v11  ;;  %277 = vmatprep.subr.mxu1 %v2195_v22  ;;  %394 = vmatprep.subr.mxu0 %v2195_v22  ;;  %v117_v29 = vrot.slane %v109_v21, %v2172_v11  ;;  %v2209_v30 = vld [vmem:[#allocation4 + $0x58] sm:$0xff]  ;;  %v2224_v38 = vld [vmem:[#allocation4 + $0x30] sm:$0xff]  ;;  %v2232_v41 = vld [vmem:[#allocation4 + $0x28] sm:$0xff]  ;;  %s2117_s8 = smov 64   ;;  %vm1717_vm3 = vcmask 1040384  }
  0x24   :  { %278 = vmatpush1.msra.mxu1 %v2197_v23  ;;  %v124_v32 = vrot.slane %v110_v26, %v2172_v11  ;;  %v2222_v37 = vld [vmem:[#allocation4 + $0x38] sm:$0xff]  ;;  %v238_v39 = vld [vmem:[%s2706_s2] sm:$0x3]  ;;  %v2235_v42 = vld [vmem:[#allocation4 + $0x20] sm:$0xff]  ;;  %vm1720_vm4 = vcmask 1041408   ;;  %vm1723_vm5 = vcmask 1042432  }
  0x25   :  { %v108_v31 = vcombine.low %v100_v24, %v107_v25  ;;  %279 = vmatprep.subr.mxu1 %v2202_v27  ;;  %340 = vrot.lane.b32.xlu1 %v238_v39, %s2116_s4  ;;  %v2238_v43 = vld [vmem:[#allocation4 + $0x18] sm:$0xff]  ;;  %v2242_v44 = vld [vmem:[#allocation4 + $0x10] sm:$0xff]  ;;  %v2246_v45 = vld [vmem:[#allocation4 + $0x8] sm:$0xff]  ;;  %vm1726_vm6 = vcmask 1043456   ;;  %vm1729_vm7 = vcmask 1044480   ;;  %vm1732_vm8 = vcmask 1045504  }
  0x26   :  { %280 = vmatpush1.msra.mxu1 %v2204_v28  ;;  %v125_v35 = vcombine.low %v117_v29, %v124_v32  ;;  %v2250_v46 = vld [vmem:[#allocation4] sm:$0xff]  ;;  %v237_v47 = vld [vmem:[%s2705_s1] sm:$0x3]  ;;  %vm1735_vm9 = vcmask 1046528   ;;  %vm2119_vm10 = vmmov 0  }
  0x27   :  { %281 = vmatprep.subr.mxu1 %v2209_v30  ;;  %v74_v51 = vld [vmem:[%s2709_s5] ss:$2 sm:$0x3] }
  0x28   :  { %282 = vmatpush1.msra.mxu1 %v2213_v33  ;;  %v128_v40 = vpack.c.bf16 %v125_v35, %v108_v31  ;;  %v133_v53 = vrot.slane %v74_v51, %v2296_v50  ;;  %v2303_v54 = vrot.slane %v74_v51, %v136_v52 }
  0x29   :  { %283 = vmatprep.subr.mxu1 %v2216_v34 }
  0x2a   :  { %284 = vmatpush1.msra.mxu1 %v2219_v36  ;;  %1876 = vmatmul.mubr.msk.bf16.vlgmr.msra.gmra.mxu0 %vm150_vm0, %v128_v40 }
  0x2b   :  { %285 = vmatprep.subr.mxu1 %v2222_v37  ;;  %395 = vmatpush1.msra.mxu0 %v2197_v23 }
  0x2c   :  { %286 = vmatpush1.msra.mxu1 %v2224_v38  ;;  %396 = vmatprep.subr.mxu0 %v2202_v27 }
  0x2d   :  { %287 = vmatprep.subr.mxu1 %v2232_v41  ;;  %397 = vmatpush1.msra.mxu0 %v2204_v28 }
  0x2e   :  { %288 = vmatpush1.msra.mxu1 %v2235_v42  ;;  %398 = vmatprep.subr.mxu0 %v2209_v30 }
  0x2f   :  { %289 = vmatprep.subr.mxu1 %v2238_v43  ;;  %399 = vmatpush1.msra.mxu0 %v2213_v33 }
  0x30   :  { %290 = vmatpush1.msra.mxu1 %v2242_v44  ;;  %400 = vmatprep.subr.mxu0 %v2216_v34 }
  0x31   :  { %291 = vmatprep.subr.mxu1 %v2246_v45  ;;  %401 = vmatpush1.msra.mxu0 %v2219_v36 }
  0x32   :  { %292 = vmatpush1.msra.mxu1 %v2250_v46  ;;  %402 = vmatprep.subr.mxu0 %v2222_v37 }
  0x33   :  { %442 = vmatprep.mubr.f32.mxu0 %v2115_v4  ;;  %403 = vmatpush1.msra.mxu0 %v2224_v38 }
  0x34   :  { %541 = vmatprep.subr.mxu1 %v2195_v22  ;;  %404 = vmatprep.subr.mxu0 %v2232_v41 }
  0x35   :  { %405 = vmatpush1.msra.mxu0 %v2235_v42 }
  0x36   :  { %406 = vmatprep.subr.mxu0 %v2238_v43 }
  0x37   :  { %407 = vmatpush1.msra.mxu0 %v2242_v44 }
  0x38   :  { %408 = vmatprep.subr.mxu0 %v2246_v45 }
  0x39   :  { %409 = vmatpush1.msra.mxu0 %v2250_v46 }
  0x3a   :  { %684 = vmatprep.subr.mxu0 %v2195_v22 }
  0x90   :  { %v2273_v48 = vpop.permute.xlu0 %244 }
  0x91   :  { %v248_v49 = vsel %vm247_vm1, %v237_v47, %v2273_v48 }
  0x92   :  { %1879 = vmatmul.mubr.msk.f32.vlgmr.msra.gmra.mxu1 %vm257_vm2, %v248_v49 }
  0x93   :  { %542 = vmatpush1.msra.mxu1 %v2197_v23  ;;  %589 = vmatprep.mubr.f32.mxu1 %v2115_v4 }
  0x94   :  { %543 = vmatprep.subr.mxu1 %v2202_v27 }
  0x95   :  { %544 = vmatpush1.msra.mxu1 %v2204_v28 }
  0x96   :  { %545 = vmatprep.subr.mxu1 %v2209_v30 }
  0x97   :  { %546 = vmatpush1.msra.mxu1 %v2213_v33  ;;  %v341_v18 = vpop.permute.xlu1 %340 }
  0x98   :  { %547 = vmatprep.subr.mxu1 %v2216_v34 }
  0x99   :  { %548 = vmatpush1.msra.mxu1 %v2219_v36 }
  0x9a   :  { %549 = vmatprep.subr.mxu1 %v2222_v37 }
  0x9b   :  { %550 = vmatpush1.msra.mxu1 %v2224_v38 }
  0x9c   :  { %551 = vmatprep.subr.mxu1 %v2232_v41 }
  0x9d   :  { %552 = vmatpush1.msra.mxu1 %v2235_v42 }
  0x9e   :  { %553 = vmatprep.subr.mxu1 %v2238_v43 }
  0x9f   :  { %554 = vmatpush1.msra.mxu1 %v2242_v44 }
  0xa0   :  { %555 = vmatprep.subr.mxu1 %v2246_v45 }
  0xa1   :  { %556 = vmatpush1.msra.mxu1 %v2250_v46 }
  0xa2   :  { %827 = vmatprep.subr.mxu1 %v2195_v22 }
  0xea   :  { %v188_v55 = vpop.f32.mrf.mxu0 }
  0xeb   :  { %v2305_v56 = vadd.f32 %v188_v55, %v133_v53 }
  0xec   :  { %v190_v57 = vpop.f32.mrf.mxu0 }
  0xed   :  { %v2308_v58 = vadd.f32 %v190_v57, %v2303_v54 }
  0xee   :  { %v192_v59 = vpop.f32.mrf.mxu0 }
  0xef   :  { %v202_v60 = vcombine.high %v2305_v56, %v2308_v58  ;;  %v2312_v61 = vadd.f32 %v192_v59, %v133_v53  ;;  %v201_v1 = vcombine.low %v2305_v56, %v2308_v58 }
  0xf0   :  { %v194_v62 = vpop.f32.mrf.mxu0 }
  0xf1   :  { %v2315_v63 = vadd.f32 %v194_v62, %v2303_v54  ;;  %v209_v2 = vrot.slane %v201_v1, %v2172_v11 }
  0xf3   :  { %v220_v0 = vcombine.high %v2312_v61, %v2315_v63  ;;  %v255_v3 = vrot.slane %v209_v2, %v2172_v11  ;;  %v217_v32 = vcombine.high %v209_v2, %v209_v2 }
  0xf5   :  { %v371_v35 = vrot.slane %v217_v32, %v2172_v11 }
  0xf7   :  { %v372_v47 = vcombine.high %v371_v35, %v371_v35 }
 0x152   :  { %v327_v5 = vpop.f32.mrf.mxu1 }
 0x153   :  { %v328_v7 = vadd.f32 %v327_v5, %v255_v3 }
 0x154   :  { %v329_v8 = vpop.f32.mrf.mxu1 }
 0x155   :  { %v1880_v9 = vmul.f32 -1.442695, %v328_v7  ;;  %v1878_v8 = vld [vmem:[%s2706_s2 + $0x2] sm:$0x3] }
 0x157   :  { %1953 = vpow2.f32 %v1880_v9 }
 0x164   :  { %v1954_v10 = vpop.eup %1953 }
 0x165   :  { %v334_v12 = vadd.f32 1.0, %v1954_v10 }
 0x167   :  { %1955 = vrcp.f32 %v334_v12 }
 0x174   :  { %v1956_v13 = vpop.eup %1955 }
 0x175   :  { %v337_v14 = vmul.f32 2.0, %v1956_v13  ;;  %v343_v19 = vmul.f32 %v1956_v13, %v341_v18 }
 0x177   :  { %v1881_v15 = vadd.f32 -1.0, %v337_v14 }
 0x179   :  { %345 = vrot.lane.b32.xlu0 %v1881_v15, %s2117_s8 }
 0x1eb   :  { %v346_v16 = vpop.permute.xlu0 %345 }
 0x1ec   :  { %v348_v17 = vmul.f32 %v1956_v13, %v346_v16 }
 0x1ee   :  { %350 = vrot.lane.b32.xlu1 %v348_v17, %s2116_s4 }
 0x260   :  { %v351_v20 = vpop.permute.xlu1 %350 }
 0x261   :  { %v353_v21 = vadd.f32 %v351_v20, %v343_v19 }
 0x263   :  { %1957 = vtanh.f32 %v353_v21 }
 0x270   :  { %v1958_v24 = vpop.eup %1957 }
 0x271   :  { %356 = vrot.lane.b32.xlu0 %v1958_v24, %s2117_s8 }
 0x2e3   :  { %v357_v25 = vpop.permute.xlu0 %356 }
 0x2e4   :  { %v359_v26 = vmul.f32 %v1956_v13, %v357_v25 }
 0x2e6   :  { %361 = vrot.lane.b32.xlu1 %v359_v26, %s2116_s4  ;;  %v2118_v26 = vmov 1966171168  }
 0x358   :  { %v362_v29 = vpop.permute.xlu1 %361 }
 0x359   :  { %v364_v31 = vsel %vm247_vm1, %v362_v29, %v2273_v48  ;;  %v1469_v29 = vunpack.c.l.s4 %v2118_v26 }
 0x35a   :  { %1882 = vmatmul.mubr.msk.f32.vlgmr.msra.gmra.mxu0 %vm257_vm2, %v364_v31 }
 0x35b   :  { %685 = vmatpush1.msra.mxu0 %v2197_v23  ;;  %732 = vmatprep.mubr.f32.mxu0 %v2115_v4 }
 0x35c   :  { %686 = vmatprep.subr.mxu0 %v2202_v27 }
 0x35d   :  { %687 = vmatpush1.msra.mxu0 %v2204_v28 }
 0x35e   :  { %688 = vmatprep.subr.mxu0 %v2209_v30 }
 0x35f   :  { %689 = vmatpush1.msra.mxu0 %v2213_v33 }
 0x360   :  { %690 = vmatprep.subr.mxu0 %v2216_v34 }
 0x361   :  { %691 = vmatpush1.msra.mxu0 %v2219_v36 }
 0x362   :  { %692 = vmatprep.subr.mxu0 %v2222_v37 }
 0x363   :  { %693 = vmatpush1.msra.mxu0 %v2224_v38 }
 0x364   :  { %694 = vmatprep.subr.mxu0 %v2232_v41 }
 0x365   :  { %695 = vmatpush1.msra.mxu0 %v2235_v42 }
 0x366   :  { %696 = vmatprep.subr.mxu0 %v2238_v43 }
 0x367   :  { %697 = vmatpush1.msra.mxu0 %v2242_v44 }
 0x368   :  { %698 = vmatprep.subr.mxu0 %v2246_v45 }
 0x369   :  { %699 = vmatpush1.msra.mxu0 %v2250_v46 }
 0x36a   :  { %970 = vmatprep.subr.mxu0 %v2195_v22 }
 0x41a   :  { %v444_v39 = vpop.f32.mrf.mxu0 }
 0x41b   :  { %v445_v40 = vadd.f32 %v444_v39, %v371_v35 }
 0x41c   :  { %v446_v48 = vpop.f32.mrf.mxu0 }
 0x41d   :  { %v1883_v49 = vmul.f32 -1.442695, %v445_v40  ;;  %v447_v51 = vadd.f32 %v446_v48, %v372_v47 }
 0x41f   :  { %1959 = vpow2.f32 %v1883_v49  ;;  %v1884_v52 = vmul.f32 -1.442695, %v447_v51 }
 0x421   :  { %1961 = vpow2.f32 %v1884_v52 }
 0x42c   :  { %v1960_v53 = vpop.eup %1959 }
 0x42d   :  { %v455_v55 = vadd.f32 1.0, %v1960_v53 }
 0x42e   :  { %v1962_v57 = vpop.eup %1961 }
 0x42f   :  { %1963 = vrcp.f32 %v455_v55  ;;  %v456_v59 = vadd.f32 1.0, %v1962_v57  ;;  %v2402_v55 = vrot.slane %v202_v60, %v2172_v11 }
 0x431   :  { %1965 = vrcp.f32 %v456_v59  ;;  %v518_v57 = vrot.slane %v2402_v55, %v2172_v11 }
 0x43c   :  { %v1964_v62 = vpop.eup %1963 }
 0x43d   :  { %v484_v1 = vmul.f32 2.0, %v1964_v62  ;;  %v486_v15 = vmul.f32 %v1964_v62, %v353_v21  ;;  %v1470_v21 = vunpack.c.0.s8 %v1469_v29 }
 0x43e   :  { %v1966_v2 = vpop.eup %1965 }
 0x43f   :  { %v1886_v3 = vadd.f32 -1.0, %v484_v1  ;;  %v461_v5 = vmul.f32 2.0, %v1966_v2  ;;  %v2365_v32 = vsub.s32 %v1470_v21, %v2162_v6  ;;  %v519_v1 = vcombine.high %v518_v57, %v518_v57 }
 0x441   :  { %488 = vrot.lane.b32.xlu1 %v1886_v3, %s2117_s8  ;;  %v1885_v7 = vadd.f32 -1.0, %v461_v5 }
 0x443   :  { %469 = vrot.lane.b32.xlu0 %v1885_v7, %s2117_s8 }
 0x447   :  { %464 = vrot.lane.b32.xlu0 %v1878_v8, %s2116_s4 }
 0x4b3   :  { %v489_v9 = vpop.permute.xlu1 %488 }
 0x4b4   :  { %v491_v10 = vmul.f32 %v1964_v62, %v489_v9 }
 0x4b5   :  { %v470_v12 = vpop.permute.xlu0 %469 }
 0x4b6   :  { %v472_v13 = vmul.f32 %v1966_v2, %v470_v12  ;;  %493 = vrot.lane.b32.xlu0 %v491_v10, %s2116_s4 }
 0x4b8   :  { %474 = vrot.lane.b32.xlu1 %v472_v13, %s2116_s4 }
 0x4b9   :  { %v465_v14 = vpop.permute.xlu0 %464 }
 0x4ba   :  { %v467_v17 = vmul.f32 %v1966_v2, %v465_v14 }
 0x528   :  { %v494_v16 = vpop.permute.xlu0 %493 }
 0x529   :  { %v2356_v18 = vadd.f32 %v494_v16, %v486_v15 }
 0x52a   :  { %v475_v19 = vpop.permute.xlu1 %474 }
 0x52b   :  { %1967 = vtanh.f32 %v2356_v18  ;;  %v2359_v20 = vadd.f32 %v475_v19, %v467_v17 }
 0x52d   :  { %1969 = vtanh.f32 %v2359_v20 }
 0x538   :  { %v1968_v24 = vpop.eup %1967 }
 0x539   :  { %499 = vrot.lane.b32.xlu0 %v1968_v24, %s2117_s8 }
 0x53a   :  { %v1970_v25 = vpop.eup %1969 }
 0x53b   :  { %480 = vrot.lane.b32.xlu1 %v1970_v25, %s2117_s8 }
 0x5ab   :  { %v500_v31 = vpop.permute.xlu0 %499 }
 0x5ac   :  { %v502_v35 = vmul.f32 %v1964_v62, %v500_v31 }
 0x5ad   :  { %v481_v39 = vpop.permute.xlu1 %480 }
 0x5ae   :  { %v483_v40 = vmul.f32 %v1966_v2, %v481_v39  ;;  %504 = vrot.lane.b32.xlu1 %v502_v35, %s2116_s4 }
 0x5b0   :  { %v2369_v47 = vrot.slane %v483_v40, %v2365_v32  ;;  %508 = vrot.lane.b32.xlu0 %v483_v40, %s2117_s8 }
 0x5b2   :  { %v1475_v48 = vcombine.high %v2369_v47, %v2369_v47  ;;  %v1482_v49 = vrot.slane %v2369_v47, %v2365_v32  ;;  %v218_v47 = vcombine.high %v2402_v55, %v2402_v55 }
 0x5b4   :  { %v2377_v51 = vrot.slane %v1475_v48, %v2365_v32 }
 0x620   :  { %v505_v6 = vpop.permute.xlu1 %504 }
 0x622   :  { %v509_v52 = vpop.permute.xlu0 %508 }
 0x623   :  { %v511_v53 = vsel %vm247_vm1, %v505_v6, %v509_v52 }
 0x624   :  { %1887 = vmatmul.mubr.msk.f32.vlgmr.msra.gmra.mxu1 %vm257_vm2, %v511_v53 }
 0x625   :  { %828 = vmatpush1.msra.mxu1 %v2197_v23  ;;  %875 = vmatprep.mubr.f32.mxu1 %v2115_v4 }
 0x626   :  { %829 = vmatprep.subr.mxu1 %v2202_v27 }
 0x627   :  { %830 = vmatpush1.msra.mxu1 %v2204_v28 }
 0x628   :  { %831 = vmatprep.subr.mxu1 %v2209_v30 }
 0x629   :  { %832 = vmatpush1.msra.mxu1 %v2213_v33 }
 0x62a   :  { %833 = vmatprep.subr.mxu1 %v2216_v34 }
 0x62b   :  { %834 = vmatpush1.msra.mxu1 %v2219_v36 }
 0x62c   :  { %835 = vmatprep.subr.mxu1 %v2222_v37 }
 0x62d   :  { %836 = vmatpush1.msra.mxu1 %v2224_v38 }
 0x62e   :  { %837 = vmatprep.subr.mxu1 %v2232_v41 }
 0x62f   :  { %838 = vmatpush1.msra.mxu1 %v2235_v42 }
 0x630   :  { %839 = vmatprep.subr.mxu1 %v2238_v43 }
 0x631   :  { %840 = vmatpush1.msra.mxu1 %v2242_v44 }
 0x632   :  { %841 = vmatprep.subr.mxu1 %v2246_v45 }
 0x633   :  { %842 = vmatpush1.msra.mxu1 %v2250_v46 }
 0x634   :  { %1113 = vmatprep.subr.mxu1 %v2195_v22 }
 0x6e4   :  { %v591_v59 = vpop.f32.mrf.mxu1 }
 0x6e5   :  { %v592_v62 = vadd.f32 %v591_v59, %v518_v57 }
 0x6e6   :  { %v593_v2 = vpop.f32.mrf.mxu1 }
 0x6e7   :  { %v1888_v3 = vmul.f32 -1.442695, %v592_v62  ;;  %v594_v5 = vadd.f32 %v593_v2, %v519_v1 }
 0x6e9   :  { %1971 = vpow2.f32 %v1888_v3  ;;  %v1889_v7 = vmul.f32 -1.442695, %v594_v5 }
 0x6eb   :  { %1973 = vpow2.f32 %v1889_v7 }
 0x6f6   :  { %v1972_v8 = vpop.eup %1971 }
 0x6f7   :  { %v602_v9 = vadd.f32 1.0, %v1972_v8 }
 0x6f8   :  { %v1974_v10 = vpop.eup %1973 }
 0x6f9   :  { %1975 = vrcp.f32 %v602_v9  ;;  %v603_v12 = vadd.f32 1.0, %v1974_v10 }
 0x6fb   :  { %1977 = vrcp.f32 %v603_v12 }
 0x706   :  { %v1976_v56 = vpop.eup %1975 }
 0x707   :  { %v627_v58 = vmul.f32 2.0, %v1976_v56  ;;  %v629_v25 = vmul.f32 %v1976_v56, %v2356_v18 }
 0x708   :  { %v1978_v60 = vpop.eup %1977 }
 0x709   :  { %v1891_v13 = vadd.f32 -1.0, %v627_v58  ;;  %v608_v14 = vmul.f32 2.0, %v1978_v60  ;;  %v610_v21 = vmul.f32 %v1978_v60, %v2359_v20 }
 0x70b   :  { %631 = vrot.lane.b32.xlu0 %v1891_v13, %s2117_s8  ;;  %v1890_v15 = vadd.f32 -1.0, %v608_v14 }
 0x70d   :  { %612 = vrot.lane.b32.xlu1 %v1890_v15, %s2117_s8 }
 0x77d   :  { %v632_v16 = vpop.permute.xlu0 %631 }
 0x77e   :  { %v634_v17 = vmul.f32 %v1976_v56, %v632_v16 }
 0x77f   :  { %v613_v19 = vpop.permute.xlu1 %612 }
 0x780   :  { %v615_v24 = vmul.f32 %v1978_v60, %v613_v19  ;;  %636 = vrot.lane.b32.xlu0 %v634_v17, %s2116_s4 }
 0x782   :  { %617 = vrot.lane.b32.xlu1 %v615_v24, %s2116_s4 }
 0x7f2   :  { %v637_v26 = vpop.permute.xlu0 %636 }
 0x7f3   :  { %v2411_v29 = vadd.f32 %v637_v26, %v629_v25 }
 0x7f4   :  { %v618_v31 = vpop.permute.xlu1 %617 }
 0x7f5   :  { %1979 = vtanh.f32 %v2411_v29  ;;  %v2415_v35 = vadd.f32 %v618_v31, %v610_v21 }
 0x7f7   :  { %1981 = vtanh.f32 %v2415_v35 }
 0x802   :  { %v1980_v39 = vpop.eup %1979 }
 0x803   :  { %642 = vrot.lane.b32.xlu0 %v1980_v39, %s2117_s8 }
 0x804   :  { %v1982_v40 = vpop.eup %1981 }
 0x805   :  { %623 = vrot.lane.b32.xlu1 %v1982_v40, %s2117_s8 }
 0x875   :  { %v643_v48 = vpop.permute.xlu0 %642 }
 0x876   :  { %v645_v18 = vmul.f32 %v1976_v56, %v643_v48 }
 0x877   :  { %v624_v6 = vpop.permute.xlu1 %623 }
 0x878   :  { %v626_v52 = vmul.f32 %v1978_v60, %v624_v6  ;;  %647 = vrot.lane.b32.xlu1 %v645_v18, %s2116_s4 }
 0x87a   :  { %v1498_v20 = vrot.slane %v626_v52, %v2365_v32  ;;  %651 = vrot.lane.b32.xlu0 %v626_v52, %s2117_s8 }
 0x87c   :  { %v1499_v53 = vcombine.high %v1498_v20, %v1498_v20  ;;  %v1506_v57 = vrot.slane %v1498_v20, %v2365_v32 }
 0x87e   :  { %v1513_v59 = vrot.slane %v1499_v53, %v2365_v32  ;;  %v1650_v62 = vrot.slane %v1506_v57, %v2296_v50 }
 0x880   :  { %v1654_v1 = vrot.slane %v1513_v59, %v2296_v50  ;;  %v2430_v2 = vsel %vm1717_vm3, %v1482_v49, %v1650_v62  ;;  %v661_v49 = vrot.slane %v218_v47, %v2172_v11 }
 0x882   :  { %v2433_v3 = vsel %vm1717_vm3, %v2377_v51, %v1654_v1  ;;  %v662_v10 = vcombine.high %v661_v49, %v661_v49 }
 0x8ea   :  { %v648_v5 = vpop.permute.xlu1 %647 }
 0x8ec   :  { %v652_v7 = vpop.permute.xlu0 %651 }
 0x8ed   :  { %v654_v8 = vsel %vm247_vm1, %v648_v5, %v652_v7 }
 0x8ee   :  { %1892 = vmatmul.mubr.msk.f32.vlgmr.msra.gmra.mxu0 %vm257_vm2, %v654_v8 }
 0x8ef   :  { %971 = vmatpush1.msra.mxu0 %v2197_v23  ;;  %1018 = vmatprep.mubr.f32.mxu0 %v2115_v4 }
 0x8f0   :  { %972 = vmatprep.subr.mxu0 %v2202_v27 }
 0x8f1   :  { %973 = vmatpush1.msra.mxu0 %v2204_v28 }
 0x8f2   :  { %974 = vmatprep.subr.mxu0 %v2209_v30 }
 0x8f3   :  { %975 = vmatpush1.msra.mxu0 %v2213_v33 }
 0x8f4   :  { %976 = vmatprep.subr.mxu0 %v2216_v34 }
 0x8f5   :  { %977 = vmatpush1.msra.mxu0 %v2219_v36 }
 0x8f6   :  { %978 = vmatprep.subr.mxu0 %v2222_v37 }
 0x8f7   :  { %979 = vmatpush1.msra.mxu0 %v2224_v38 }
 0x8f8   :  { %980 = vmatprep.subr.mxu0 %v2232_v41 }
 0x8f9   :  { %981 = vmatpush1.msra.mxu0 %v2235_v42 }
 0x8fa   :  { %982 = vmatprep.subr.mxu0 %v2238_v43 }
 0x8fb   :  { %983 = vmatpush1.msra.mxu0 %v2242_v44 }
 0x8fc   :  { %984 = vmatprep.subr.mxu0 %v2246_v45 }
 0x8fd   :  { %985 = vmatpush1.msra.mxu0 %v2250_v46 }
 0x8fe   :  { %1256 = vmatprep.subr.mxu0 %v2195_v22 }
 0x9ae   :  { %v734_v51 = vpop.f32.mrf.mxu0 }
 0x9af   :  { %v735_v9 = vadd.f32 %v734_v51, %v661_v49 }
 0x9b0   :  { %v736_v12 = vpop.f32.mrf.mxu0 }
 0x9b1   :  { %v1893_v56 = vmul.f32 -1.442695, %v735_v9  ;;  %v737_v58 = vadd.f32 %v736_v12, %v662_v10 }
 0x9b3   :  { %1983 = vpow2.f32 %v1893_v56  ;;  %v1894_v60 = vmul.f32 -1.442695, %v737_v58 }
 0x9b5   :  { %1985 = vpow2.f32 %v1894_v60 }
 0x9c0   :  { %v1984_v13 = vpop.eup %1983 }
 0x9c1   :  { %v745_v14 = vadd.f32 1.0, %v1984_v13 }
 0x9c2   :  { %v1986_v15 = vpop.eup %1985 }
 0x9c3   :  { %1987 = vrcp.f32 %v745_v14  ;;  %v746_v16 = vadd.f32 1.0, %v1986_v15 }
 0x9c5   :  { %1989 = vrcp.f32 %v746_v16 }
 0x9d0   :  { %v1988_v17 = vpop.eup %1987 }
 0x9d1   :  { %v770_v19 = vmul.f32 2.0, %v1988_v17  ;;  %v772_v48 = vmul.f32 %v1988_v17, %v2411_v29 }
 0x9d2   :  { %v1990_v55 = vpop.eup %1989 }
 0x9d3   :  { %v1896_v24 = vadd.f32 -1.0, %v770_v19  ;;  %v751_v25 = vmul.f32 2.0, %v1990_v55  ;;  %v753_v52 = vmul.f32 %v1990_v55, %v2415_v35 }
 0x9d5   :  { %774 = vrot.lane.b32.xlu0 %v1896_v24, %s2117_s8  ;;  %v1895_v26 = vadd.f32 -1.0, %v751_v25 }
 0x9d7   :  { %755 = vrot.lane.b32.xlu1 %v1895_v26, %s2117_s8 }
 0xa47   :  { %v775_v21 = vpop.permute.xlu0 %774 }
 0xa48   :  { %v777_v31 = vmul.f32 %v1988_v17, %v775_v21 }
 0xa49   :  { %v756_v39 = vpop.permute.xlu1 %755 }
 0xa4a   :  { %v758_v40 = vmul.f32 %v1990_v55, %v756_v39  ;;  %779 = vrot.lane.b32.xlu0 %v777_v31, %s2116_s4 }
 0xa4c   :  { %760 = vrot.lane.b32.xlu1 %v758_v40, %s2116_s4 }
 0xabc   :  { %v780_v18 = vpop.permute.xlu0 %779 }
 0xabd   :  { %v2462_v6 = vadd.f32 %v780_v18, %v772_v48 }
 0xabe   :  { %v761_v20 = vpop.permute.xlu1 %760 }
 0xabf   :  { %1991 = vtanh.f32 %v2462_v6  ;;  %v2466_v53 = vadd.f32 %v761_v20, %v753_v52 }
 0xac1   :  { %1993 = vtanh.f32 %v2466_v53 }
 0xacc   :  { %v1992_v57 = vpop.eup %1991 }
 0xacd   :  { %785 = vrot.lane.b32.xlu0 %v1992_v57, %s2117_s8 }
 0xace   :  { %v1994_v59 = vpop.eup %1993 }
 0xacf   :  { %766 = vrot.lane.b32.xlu1 %v1994_v59, %s2117_s8 }
 0xb3f   :  { %v786_v62 = vpop.permute.xlu0 %785 }
 0xb40   :  { %v788_v29 = vmul.f32 %v1988_v17, %v786_v62 }
 0xb41   :  { %v767_v1 = vpop.permute.xlu1 %766 }
 0xb42   :  { %v769_v5 = vmul.f32 %v1990_v55, %v767_v1  ;;  %790 = vrot.lane.b32.xlu1 %v788_v29, %s2116_s4 }
 0xb44   :  { %v1520_v35 = vrot.slane %v769_v5, %v2365_v32  ;;  %794 = vrot.lane.b32.xlu0 %v769_v5, %s2117_s8 }
 0xb46   :  { %v1521_v7 = vcombine.high %v1520_v35, %v1520_v35  ;;  %v1528_v8 = vrot.slane %v1520_v35, %v2365_v32 }
 0xb48   :  { %v1535_v47 = vrot.slane %v1521_v7, %v2365_v32  ;;  %v1660_v49 = vrot.slane %v1528_v8, %v2296_v50 }
 0xb4a   :  { %v1664_v51 = vrot.slane %v1535_v47, %v2296_v50  ;;  %v2480_v9 = vsel %vm1720_vm4, %v2430_v2, %v1660_v49  ;;  %v219_v2 = vcombine.low %v2312_v61, %v2315_v63 }
 0xb4c   :  { %v2484_v10 = vsel %vm1720_vm4, %v2433_v3, %v1664_v51  ;;  %v2508_v3 = vrot.slane %v219_v2, %v2172_v11 }
 0xb4e   :  { %v804_v60 = vrot.slane %v2508_v3, %v2172_v11 }
 0xb50   :  { %v805_v15 = vcombine.high %v804_v60, %v804_v60 }
 0xbb4   :  { %v791_v12 = vpop.permute.xlu1 %790 }
 0xbb6   :  { %v795_v56 = vpop.permute.xlu0 %794 }
 0xbb7   :  { %v797_v58 = vsel %vm247_vm1, %v791_v12, %v795_v56 }
 0xbb8   :  { %1897 = vmatmul.mubr.msk.f32.vlgmr.msra.gmra.mxu1 %vm257_vm2, %v797_v58 }
 0xbb9   :  { %1114 = vmatpush1.msra.mxu1 %v2197_v23  ;;  %1161 = vmatprep.mubr.f32.mxu1 %v2115_v4 }
 0xbba   :  { %1115 = vmatprep.subr.mxu1 %v2202_v27 }
 0xbbb   :  { %1116 = vmatpush1.msra.mxu1 %v2204_v28 }
 0xbbc   :  { %1117 = vmatprep.subr.mxu1 %v2209_v30 }
 0xbbd   :  { %1118 = vmatpush1.msra.mxu1 %v2213_v33 }
 0xbbe   :  { %1119 = vmatprep.subr.mxu1 %v2216_v34 }
 0xbbf   :  { %1120 = vmatpush1.msra.mxu1 %v2219_v36 }
 0xbc0   :  { %1121 = vmatprep.subr.mxu1 %v2222_v37 }
 0xbc1   :  { %1122 = vmatpush1.msra.mxu1 %v2224_v38 }
 0xbc2   :  { %1123 = vmatprep.subr.mxu1 %v2232_v41 }
 0xbc3   :  { %1124 = vmatpush1.msra.mxu1 %v2235_v42 }
 0xbc4   :  { %1125 = vmatprep.subr.mxu1 %v2238_v43 }
 0xbc5   :  { %1126 = vmatpush1.msra.mxu1 %v2242_v44 }
 0xbc6   :  { %1127 = vmatprep.subr.mxu1 %v2246_v45 }
 0xbc7   :  { %1128 = vmatpush1.msra.mxu1 %v2250_v46 }
 0xbc8   :  { %1389 = vmatprep.subr.mxu1 %v2195_v22 }
 0xc78   :  { %v877_v13 = vpop.f32.mrf.mxu1 }
 0xc79   :  { %v878_v14 = vadd.f32 %v877_v13, %v804_v60 }
 0xc7a   :  { %v879_v16 = vpop.f32.mrf.mxu1 }
 0xc7b   :  { %v1898_v17 = vmul.f32 -1.442695, %v878_v14  ;;  %v880_v19 = vadd.f32 %v879_v16, %v805_v15 }
 0xc7d   :  { %1995 = vpow2.f32 %v1898_v17  ;;  %v1899_v55 = vmul.f32 -1.442695, %v880_v19 }
 0xc7f   :  { %1997 = vpow2.f32 %v1899_v55 }
 0xc8a   :  { %v1996_v24 = vpop.eup %1995 }
 0xc8b   :  { %v888_v22 = vadd.f32 1.0, %v1996_v24 }
 0xc8c   :  { %v1998_v25 = vpop.eup %1997 }
 0xc8d   :  { %1999 = vrcp.f32 %v888_v22  ;;  %v889_v26 = vadd.f32 1.0, %v1998_v25 }
 0xc8f   :  { %2001 = vrcp.f32 %v889_v26 }
 0xc9a   :  { %v2000_v21 = vpop.eup %1999 }
 0xc9b   :  { %v913_v31 = vmul.f32 2.0, %v2000_v21  ;;  %v915_v62 = vmul.f32 %v2000_v21, %v2462_v6 }
 0xc9c   :  { %v2002_v39 = vpop.eup %2001 }
 0xc9d   :  { %v1901_v40 = vadd.f32 -1.0, %v913_v31  ;;  %v894_v48 = vmul.f32 2.0, %v2002_v39  ;;  %v896_v5 = vmul.f32 %v2002_v39, %v2466_v53 }
 0xc9f   :  { %917 = vrot.lane.b32.xlu0 %v1901_v40, %s2117_s8  ;;  %v1900_v18 = vadd.f32 -1.0, %v894_v48 }
 0xca1   :  { %898 = vrot.lane.b32.xlu1 %v1900_v18, %s2117_s8 }
 0xd11   :  { %v918_v52 = vpop.permute.xlu0 %917 }
 0xd12   :  { %v920_v20 = vmul.f32 %v2000_v21, %v918_v52 }
 0xd13   :  { %v899_v57 = vpop.permute.xlu1 %898 }
 0xd14   :  { %v901_v59 = vmul.f32 %v2002_v39, %v899_v57  ;;  %922 = vrot.lane.b32.xlu0 %v920_v20, %s2116_s4 }
 0xd16   :  { %903 = vrot.lane.b32.xlu1 %v901_v59, %s2116_s4 }
 0xd86   :  { %v923_v29 = vpop.permute.xlu0 %922 }
 0xd87   :  { %v2517_v1 = vadd.f32 %v923_v29, %v915_v62 }
 0xd88   :  { %v904_v35 = vpop.permute.xlu1 %903 }
 0xd89   :  { %2003 = vtanh.f32 %v2517_v1  ;;  %v2521_v7 = vadd.f32 %v904_v35, %v896_v5 }
 0xd8b   :  { %2005 = vtanh.f32 %v2521_v7 }
 0xd96   :  { %v2004_v8 = vpop.eup %2003 }
 0xd97   :  { %928 = vrot.lane.b32.xlu0 %v2004_v8, %s2117_s8 }
 0xd98   :  { %v2006_v47 = vpop.eup %2005 }
 0xd99   :  { %909 = vrot.lane.b32.xlu1 %v2006_v47, %s2117_s8 }
 0xe09   :  { %v929_v49 = vpop.permute.xlu0 %928 }
 0xe0a   :  { %v931_v6 = vmul.f32 %v2000_v21, %v929_v49 }
 0xe0b   :  { %v910_v51 = vpop.permute.xlu1 %909 }
 0xe0c   :  { %v912_v12 = vmul.f32 %v2002_v39, %v910_v51  ;;  %933 = vrot.lane.b32.xlu1 %v931_v6, %s2116_s4 }
 0xe0e   :  { %v1542_v53 = vrot.slane %v912_v12, %v2365_v32  ;;  %937 = vrot.lane.b32.xlu0 %v912_v12, %s2117_s8 }
 0xe10   :  { %v1543_v56 = vcombine.high %v1542_v53, %v1542_v53  ;;  %v1550_v58 = vrot.slane %v1542_v53, %v2365_v32 }
 0xe12   :  { %v1557_v2 = vrot.slane %v1543_v56, %v2365_v32  ;;  %v1670_v60 = vrot.slane %v1550_v58, %v2296_v50 }
 0xe14   :  { %v1674_v13 = vrot.slane %v1557_v2, %v2296_v50  ;;  %v2534_v14 = vsel %vm1723_vm5, %v2480_v9, %v1670_v60 }
 0xe16   :  { %v2537_v15 = vsel %vm1723_vm5, %v2484_v10, %v1674_v13 }
 0xe7e   :  { %v934_v16 = vpop.permute.xlu1 %933 }
 0xe80   :  { %v938_v17 = vpop.permute.xlu0 %937 }
 0xe81   :  { %v940_v19 = vsel %vm247_vm1, %v934_v16, %v938_v17  ;;  %v2053_v16 = vld [vmem:[#allocation4 + $0x70] sm:$0xff]  ;;  %v2054_v17 = vld [vmem:[#allocation4 + $0x68] sm:$0xff] }
 0xe82   :  { %1902 = vmatmul.mubr.msk.f32.vlgmr.msra.gmra.mxu0 %vm257_vm2, %v940_v19  ;;  %v2055_v19 = vld [vmem:[#allocation4 + $0x60] sm:$0xff] }
 0xe83   :  { %1257 = vmatpush1.msra.mxu0 %v2197_v23  ;;  %1304 = vmatprep.mubr.f32.mxu0 %v2115_v4  ;;  %v235_v23 = vcombine.high %v2508_v3, %v2508_v3 }
 0xe84   :  { %1258 = vmatprep.subr.mxu0 %v2202_v27 }
 0xe85   :  { %1259 = vmatpush1.msra.mxu0 %v2204_v28  ;;  %v947_v27 = vrot.slane %v235_v23, %v2172_v11  ;;  %v2057_v23 = vld [vmem:[#allocation4 + $0x50] sm:$0xff] }
 0xe86   :  { %1260 = vmatprep.subr.mxu0 %v2209_v30 }
 0xe87   :  { %1261 = vmatpush1.msra.mxu0 %v2213_v33  ;;  %v948_v33 = vcombine.high %v947_v27, %v947_v27 }
 0xe88   :  { %1262 = vmatprep.subr.mxu0 %v2216_v34 }
 0xe89   :  { %1263 = vmatpush1.msra.mxu0 %v2219_v36 }
 0xe8a   :  { %1264 = vmatprep.subr.mxu0 %v2222_v37 }
 0xe8b   :  { %1265 = vmatpush1.msra.mxu0 %v2224_v38 }
 0xe8c   :  { %1266 = vmatprep.subr.mxu0 %v2232_v41 }
 0xe8d   :  { %1267 = vmatpush1.msra.mxu0 %v2235_v42 }
 0xe8e   :  { %1268 = vmatprep.subr.mxu0 %v2238_v43 }
 0xe8f   :  { %1269 = vmatpush1.msra.mxu0 %v2242_v44 }
 0xe90   :  { %1270 = vmatprep.subr.mxu0 %v2246_v45 }
 0xe91   :  { %1271 = vmatpush1.msra.mxu0 %v2250_v46 }
 0xe92   :  { %1927 = vmatprep.subr.bf16.mxu0 %v2115_v4 }
 0xf42   :  { %v1020_v28 = vpop.f32.mrf.mxu0 }
 0xf43   :  { %v1021_v30 = vadd.f32 %v1020_v28, %v947_v27  ;;  %v2059_v27 = vld [vmem:[#allocation4 + $0x40] sm:$0xff]  ;;  %v2060_v28 = vld [vmem:[#allocation4 + $0x38] sm:$0xff] }
 0xf44   :  { %v1022_v34 = vpop.f32.mrf.mxu0 }
 0xf45   :  { %v1903_v36 = vmul.f32 -1.442695, %v1021_v30  ;;  %v1023_v37 = vadd.f32 %v1022_v34, %v948_v33  ;;  %v2061_v30 = vld [vmem:[#allocation4 + $0x30] sm:$0xff]  ;;  %v2062_v33 = vld [vmem:[#allocation4 + $0x28] sm:$0xff]  ;;  %v2602_v34 = vrot.slane %v220_v0, %v2172_v11 }
 0xf47   :  { %2007 = vpow2.f32 %v1903_v36  ;;  %v1904_v38 = vmul.f32 -1.442695, %v1023_v37  ;;  %v1090_v36 = vrot.slane %v2602_v34, %v2172_v11 }
 0xf49   :  { %2009 = vpow2.f32 %v1904_v38 }
 0xf54   :  { %v2008_v41 = vpop.eup %2007 }
 0xf55   :  { %v1031_v9 = vadd.f32 1.0, %v2008_v41 }
 0xf56   :  { %v2010_v10 = vpop.eup %2009 }
 0xf57   :  { %2011 = vrcp.f32 %v1031_v9  ;;  %v1032_v55 = vadd.f32 1.0, %v2010_v10 }
 0xf59   :  { %2013 = vrcp.f32 %v1032_v55 }
 0xf64   :  { %v2012_v24 = vpop.eup %2011 }
 0xf65   :  { %v1056_v22 = vmul.f32 2.0, %v2012_v24  ;;  %v1058_v18 = vmul.f32 %v2012_v24, %v2517_v1 }
 0xf66   :  { %v2014_v3 = vpop.eup %2013 }
 0xf67   :  { %v1906_v25 = vadd.f32 -1.0, %v1056_v22  ;;  %v1037_v26 = vmul.f32 2.0, %v2014_v3  ;;  %v1039_v57 = vmul.f32 %v2014_v3, %v2521_v7 }
 0xf69   :  { %1060 = vrot.lane.b32.xlu0 %v1906_v25, %s2117_s8  ;;  %v1905_v21 = vadd.f32 -1.0, %v1037_v26 }
 0xf6b   :  { %1041 = vrot.lane.b32.xlu1 %v1905_v21, %s2117_s8 }
 0xfdb   :  { %v1061_v31 = vpop.permute.xlu0 %1060 }
 0xfdc   :  { %v1063_v39 = vmul.f32 %v2012_v24, %v1061_v31 }
 0xfdd   :  { %v1042_v40 = vpop.permute.xlu1 %1041 }
 0xfde   :  { %v1044_v48 = vmul.f32 %v2014_v3, %v1042_v40  ;;  %1065 = vrot.lane.b32.xlu0 %v1063_v39, %s2116_s4 }
 0xfe0   :  { %1046 = vrot.lane.b32.xlu1 %v1044_v48, %s2116_s4 }
0x1050   :  { %v1066_v52 = vpop.permute.xlu0 %1065 }
0x1051   :  { %v2566_v20 = vadd.f32 %v1066_v52, %v1058_v18 }
0x1052   :  { %v1047_v59 = vpop.permute.xlu1 %1046 }
0x1053   :  { %2015 = vtanh.f32 %v2566_v20  ;;  %v2570_v62 = vadd.f32 %v1047_v59, %v1039_v57 }
0x1055   :  { %2017 = vtanh.f32 %v2570_v62 }
0x1060   :  { %v2016_v29 = vpop.eup %2015 }
0x1061   :  { %1071 = vrot.lane.b32.xlu0 %v2016_v29, %s2117_s8 }
0x1062   :  { %v2018_v5 = vpop.eup %2017 }
0x1063   :  { %1052 = vrot.lane.b32.xlu1 %v2018_v5, %s2117_s8 }
0x10d3   :  { %v1072_v35 = vpop.permute.xlu0 %1071 }
0x10d4   :  { %v1074_v1 = vmul.f32 %v2012_v24, %v1072_v35 }
0x10d5   :  { %v1053_v8 = vpop.permute.xlu1 %1052 }
0x10d6   :  { %v1055_v47 = vmul.f32 %v2014_v3, %v1053_v8  ;;  %1076 = vrot.lane.b32.xlu1 %v1074_v1, %s2116_s4 }
0x10d8   :  { %v1564_v7 = vrot.slane %v1055_v47, %v2365_v32  ;;  %1080 = vrot.lane.b32.xlu0 %v1055_v47, %s2117_s8 }
0x10da   :  { %v1565_v49 = vcombine.high %v1564_v7, %v1564_v7  ;;  %v1572_v6 = vrot.slane %v1564_v7, %v2365_v32 }
0x10dc   :  { %v1579_v51 = vrot.slane %v1565_v49, %v2365_v32  ;;  %v1680_v12 = vrot.slane %v1572_v6, %v2296_v50 }
0x10de   :  { %v1684_v53 = vrot.slane %v1579_v51, %v2296_v50  ;;  %v2584_v56 = vsel %vm1726_vm6, %v2534_v14, %v1680_v12  ;;  %v2056_v14 = vld [vmem:[#allocation4 + $0x58] sm:$0xff] }
0x10e0   :  { %v2588_v58 = vsel %vm1726_vm6, %v2537_v15, %v1684_v53  ;;  %v2058_v15 = vld [vmem:[#allocation4 + $0x48] sm:$0xff] }
0x1148   :  { %v1077_v2 = vpop.permute.xlu1 %1076 }
0x114a   :  { %v1081_v60 = vpop.permute.xlu0 %1080 }
0x114b   :  { %v1083_v13 = vsel %vm247_vm1, %v1077_v2, %v1081_v60 }
0x114c   :  { %1907 = vmatmul.mubr.msk.f32.vlgmr.msra.gmra.mxu1 %vm257_vm2, %v1083_v13  ;;  %v236_v13 = vcombine.high %v2602_v34, %v2602_v34 }
0x114d   :  { %1390 = vmatpush1.msra.mxu1 %v2053_v16  ;;  %1437 = vmatprep.mubr.f32.mxu1 %v2115_v4 }
0x114e   :  { %1391 = vmatprep.subr.mxu1 %v2054_v17  ;;  %v1233_v16 = vrot.slane %v236_v13, %v2172_v11 }
0x114f   :  { %1392 = vmatpush1.msra.mxu1 %v2055_v19 }
0x1150   :  { %1393 = vmatprep.subr.mxu1 %v2056_v14  ;;  %v1234_v14 = vcombine.high %v1233_v16, %v1233_v16 }
0x1151   :  { %1394 = vmatpush1.msra.mxu1 %v2057_v23 }
0x1152   :  { %1395 = vmatprep.subr.mxu1 %v2058_v15 }
0x1153   :  { %1396 = vmatpush1.msra.mxu1 %v2059_v27 }
0x1154   :  { %1397 = vmatprep.subr.mxu1 %v2060_v28 }
0x1155   :  { %1398 = vmatpush1.msra.mxu1 %v2061_v30 }
0x1156   :  { %1399 = vmatprep.subr.mxu1 %v2062_v33 }
0x1157   :  { %1400 = vmatpush1.msra.mxu1 %v2235_v42  ;;  %v1091_v42 = vcombine.high %v1090_v36, %v1090_v36 }
0x1158   :  { %1401 = vmatprep.subr.mxu1 %v2238_v43 }
0x1159   :  { %1402 = vmatpush1.msra.mxu1 %v2242_v44 }
0x115a   :  { %1403 = vmatprep.subr.mxu1 %v2246_v45 }
0x115b   :  { %1404 = vmatpush1.msra.mxu1 %v2250_v46 }
0x120c   :  { %v1163_v37 = vpop.f32.mrf.mxu1 }
0x120d   :  { %v1164_v38 = vadd.f32 %v1163_v37, %v1090_v36 }
0x120e   :  { %v1165_v41 = vpop.f32.mrf.mxu1 }
0x120f   :  { %v1908_v43 = vmul.f32 -1.442695, %v1164_v38  ;;  %v1166_v9 = vadd.f32 %v1165_v41, %v1091_v42 }
0x1211   :  { %2019 = vpow2.f32 %v1908_v43  ;;  %v1909_v44 = vmul.f32 -1.442695, %v1166_v9 }
0x1213   :  { %2021 = vpow2.f32 %v1909_v44 }
0x121e   :  { %v2020_v45 = vpop.eup %2019 }
0x121f   :  { %v1174_v46 = vadd.f32 1.0, %v2020_v45 }
0x1220   :  { %v2022_v10 = vpop.eup %2021 }
0x1221   :  { %2023 = vrcp.f32 %v1174_v46  ;;  %v1175_v55 = vadd.f32 1.0, %v2022_v10 }
0x1223   :  { %2025 = vrcp.f32 %v1175_v55 }
0x122e   :  { %v2024_v61 = vpop.eup %2023 }
0x122f   :  { %v1199_v63 = vmul.f32 2.0, %v2024_v61  ;;  %v1201_v39 = vmul.f32 %v2024_v61, %v2566_v20 }
0x1230   :  { %v2026_v0 = vpop.eup %2025 }
0x1231   :  { %v1911_v24 = vadd.f32 -1.0, %v1199_v63  ;;  %v1180_v22 = vmul.f32 2.0, %v2026_v0  ;;  %v1182_v18 = vmul.f32 %v2026_v0, %v2570_v62 }
0x1233   :  { %1203 = vrot.lane.b32.xlu0 %v1911_v24, %s2117_s8  ;;  %v1910_v3 = vadd.f32 -1.0, %v1180_v22 }
0x1235   :  { %1184 = vrot.lane.b32.xlu1 %v1910_v3, %s2117_s8 }
0x12a5   :  { %v1204_v25 = vpop.permute.xlu0 %1203 }
0x12a6   :  { %v1206_v26 = vmul.f32 %v2024_v61, %v1204_v25 }
0x12a7   :  { %v1185_v21 = vpop.permute.xlu1 %1184 }
0x12a8   :  { %v1187_v31 = vmul.f32 %v2026_v0, %v1185_v21  ;;  %1208 = vrot.lane.b32.xlu0 %v1206_v26, %s2116_s4 }
0x12aa   :  { %1189 = vrot.lane.b32.xlu1 %v1187_v31, %s2116_s4 }
0x131a   :  { %v1209_v40 = vpop.permute.xlu0 %1208 }
0x131b   :  { %v1211_v48 = vadd.f32 %v1209_v40, %v1201_v39 }
0x131c   :  { %v1190_v52 = vpop.permute.xlu1 %1189 }
0x131d   :  { %2027 = vtanh.f32 %v1211_v48  ;;  %v1192_v57 = vadd.f32 %v1190_v52, %v1182_v18 }
0x131f   :  { %2029 = vtanh.f32 %v1192_v57 }
0x132a   :  { %v2028_v59 = vpop.eup %2027 }
0x132b   :  { %1214 = vrot.lane.b32.xlu0 %v2028_v59, %s2117_s8 }
0x132c   :  { %v2030_v29 = vpop.eup %2029 }
0x132d   :  { %1195 = vrot.lane.b32.xlu1 %v2030_v29, %s2117_s8 }
0x139d   :  { %v1215_v5 = vpop.permute.xlu0 %1214 }
0x139e   :  { %v1217_v35 = vmul.f32 %v2024_v61, %v1215_v5 }
0x139f   :  { %v1196_v1 = vpop.permute.xlu1 %1195 }
0x13a0   :  { %v1198_v8 = vmul.f32 %v2026_v0, %v1196_v1  ;;  %1219 = vrot.lane.b32.xlu1 %v1217_v35, %s2116_s4 }
0x13a2   :  { %v1586_v20 = vrot.slane %v1198_v8, %v2365_v32  ;;  %1223 = vrot.lane.b32.xlu0 %v1198_v8, %s2117_s8 }
0x13a4   :  { %v1587_v62 = vcombine.high %v1586_v20, %v1586_v20  ;;  %v1594_v47 = vrot.slane %v1586_v20, %v2365_v32 }
0x13a6   :  { %v1601_v7 = vrot.slane %v1587_v62, %v2365_v32  ;;  %v1690_v49 = vrot.slane %v1594_v47, %v2296_v50 }
0x13a8   :  { %v1694_v6 = vrot.slane %v1601_v7, %v2296_v50  ;;  %v1730_v51 = vsel %vm1729_vm7, %v2584_v56, %v1690_v49 }
0x13aa   :  { %v2623_v12 = vsel %vm1729_vm7, %v2588_v58, %v1694_v6 }
0x1412   :  { %v1220_v53 = vpop.permute.xlu1 %1219 }
0x1414   :  { %v1224_v2 = vpop.permute.xlu0 %1223 }
0x1415   :  { %v1226_v60 = vsel %vm247_vm1, %v1220_v53, %v1224_v2 }
0x1416   :  { %1912 = vmatmul.mubr.msk.f32.vlgmr.msra.gmra.mxu0 %vm257_vm2, %v1226_v60 }
0x1417   :  { %1931 = vmatprep.mubr.msk.bf16.mxu0 %vm2119_vm10, %v2115_v4 }
0x14d6   :  { %v1306_v17 = vpop.f32.mrf.mxu0 }
0x14d7   :  { %v1307_v19 = vadd.f32 %v1306_v17, %v1233_v16 }
0x14d8   :  { %v1308_v23 = vpop.f32.mrf.mxu0 }
0x14d9   :  { %v1913_v15 = vmul.f32 -1.442695, %v1307_v19  ;;  %v1309_v56 = vadd.f32 %v1308_v23, %v1234_v14 }
0x14db   :  { %2031 = vpow2.f32 %v1913_v15  ;;  %v1914_v58 = vmul.f32 -1.442695, %v1309_v56 }
0x14dd   :  { %2033 = vpow2.f32 %v1914_v58 }
0x14e8   :  { %v2032_v27 = vpop.eup %2031 }
0x14e9   :  { %v1317_v28 = vadd.f32 1.0, %v2032_v27 }
0x14ea   :  { %v2034_v30 = vpop.eup %2033 }
0x14eb   :  { %2035 = vrcp.f32 %v1317_v28  ;;  %v1318_v33 = vadd.f32 1.0, %v2034_v30 }
0x14ed   :  { %2037 = vrcp.f32 %v1318_v33 }
0x14f8   :  { %v2036_v36 = vpop.eup %2035 }
0x14f9   :  { %v1342_v37 = vmul.f32 2.0, %v2036_v36  ;;  %v1344_v45 = vmul.f32 %v2036_v36, %v1211_v48 }
0x14fa   :  { %v2038_v34 = vpop.eup %2037 }
0x14fb   :  { %v1916_v38 = vadd.f32 -1.0, %v1342_v37  ;;  %v1323_v11 = vmul.f32 2.0, %v2038_v34  ;;  %v1325_v55 = vmul.f32 %v2038_v34, %v1192_v57 }
0x14fd   :  { %1346 = vrot.lane.b32.xlu0 %v1916_v38, %s2117_s8  ;;  %v1915_v42 = vadd.f32 -1.0, %v1323_v11 }
0x14ff   :  { %1327 = vrot.lane.b32.xlu1 %v1915_v42, %s2117_s8 }
0x156f   :  { %v1347_v41 = vpop.permute.xlu0 %1346 }
0x1570   :  { %v1349_v43 = vmul.f32 %v2036_v36, %v1347_v41 }
0x1571   :  { %v1328_v9 = vpop.permute.xlu1 %1327 }
0x1572   :  { %v1330_v44 = vmul.f32 %v2038_v34, %v1328_v9  ;;  %1351 = vrot.lane.b32.xlu0 %v1349_v43, %s2116_s4 }
0x1574   :  { %1332 = vrot.lane.b32.xlu1 %v1330_v44, %s2116_s4 }
0x15e4   :  { %v1352_v46 = vpop.permute.xlu0 %1351 }
0x15e5   :  { %v2634_v10 = vadd.f32 %v1352_v46, %v1344_v45 }
0x15e6   :  { %v1333_v61 = vpop.permute.xlu1 %1332 }
0x15e7   :  { %2039 = vtanh.f32 %v2634_v10  ;;  %v1335_v63 = vadd.f32 %v1333_v61, %v1325_v55  ;;  %v1848_v46 = vrot.slane %v2634_v10, 4  ;;  %v1951_v55 = vld [vmem:[#allocation2 + $0x20] ss:$8 sps:$4 sm:$0xff]   ;;  %v1952_v61 = vld [vmem:[#allocation2 + $0x10] ss:$8 sps:$4 sm:$0xff]  }
0x15e8   :  { %1928 = vmatpush3.bf16.msra.mxu0 %v1951_v55 }
0x15e9   :  { %2041 = vtanh.f32 %v1335_v63  ;;  %1929 = vmatprep.subr.bf16.mxu0 %v2115_v4 }
0x15ec   :  { %1930 = vmatpush3.bf16.msra.mxu0 %v1952_v61 }
0x15f4   :  { %v2040_v0 = vpop.eup %2039 }
0x15f5   :  { %1357 = vrot.lane.b32.xlu0 %v2040_v0, %s2117_s8 }
0x15f6   :  { %v2042_v24 = vpop.eup %2041 }
0x15f7   :  { %1338 = vrot.lane.b32.xlu1 %v2042_v24, %s2117_s8 }
0x1667   :  { %v1358_v22 = vpop.permute.xlu0 %1357 }
0x1668   :  { %v2639_v3 = vmul.f32 %v2036_v36, %v1358_v22 }
0x1669   :  { %v1339_v25 = vpop.permute.xlu1 %1338 }
0x166a   :  { %v1341_v26 = vmul.f32 %v2038_v34, %v1339_v25  ;;  %1362 = vrot.lane.b32.xlu1 %v2639_v3, %s2116_s4 }
0x166c   :  { %v1608_v21 = vrot.slane %v1341_v26, %v2365_v32  ;;  %1366 = vrot.lane.b32.xlu0 %v1341_v26, %s2117_s8 }
0x166e   :  { %v1609_v31 = vcombine.high %v1608_v21, %v1608_v21  ;;  %v1616_v39 = vrot.slane %v1608_v21, %v2365_v32 }
0x1670   :  { %v1623_v40 = vrot.slane %v1609_v31, %v2365_v32  ;;  %v1700_v48 = vrot.slane %v1616_v39, %v2296_v50 }
0x1672   :  { %v1733_v18 = vsel %vm1732_vm8, %v1730_v51, %v1700_v48  ;;  %v1704_v52 = vrot.slane %v1623_v40, %v2296_v50 }
0x1674   :  { %v1734_v57 = vsel %vm1732_vm8, %v2623_v12, %v1704_v52 }
0x16dc   :  { %v1363_v59 = vpop.permute.xlu1 %1362 }
0x16de   :  { %v1367_v29 = vpop.permute.xlu0 %1366 }
0x16df   :  { %v1369_v5 = vsel %vm247_vm1, %v1363_v59, %v1367_v29 }
0x16e0   :  { %1917 = vmatmul.mubr.msk.f32.vlgmr.msra.gmra.mxu1 %vm257_vm2, %v1369_v5 }
0x17a0   :  { %v1439_v35 = vpop.f32.mrf.mxu1 }
0x17a2   :  { %v1440_v1 = vpop.f32.mrf.mxu1 }
0x17a3   :  { %v1441_v8 = vadd.f32 %v1440_v1, %v2303_v54 }
0x17a5   :  { %v1918_v20 = vmul.f32 -1.442695, %v1441_v8  ;;  %v1920_v8 = vld [vmem:[%s2709_s5 + $0x1] ss:$0 sm:$0xff] }
0x17a7   :  { %2043 = vpow2.f32 %v1918_v20 }
0x17b4   :  { %v2044_v62 = vpop.eup %2043 }
0x17b5   :  { %v1446_v47 = vadd.f32 1.0, %v2044_v62 }
0x17b7   :  { %2045 = vrcp.f32 %v1446_v47 }
0x17c4   :  { %v2046_v7 = vpop.eup %2045 }
0x17c5   :  { %v1449_v49 = vmul.f32 2.0, %v2046_v7  ;;  %v1451_v53 = vmul.f32 %v2046_v7, %v1335_v63 }
0x17c7   :  { %v1919_v6 = vadd.f32 -1.0, %v1449_v49 }
0x17c9   :  { %1453 = vrot.lane.b32.xlu1 %v1919_v6, %s2117_s8 }
0x183b   :  { %v1454_v51 = vpop.permute.xlu1 %1453 }
0x183c   :  { %v1456_v12 = vmul.f32 %v2046_v7, %v1454_v51 }
0x183e   :  { %1458 = vrot.lane.b32.xlu0 %v1456_v12, %s2116_s4 }
0x18b0   :  { %v1459_v2 = vpop.permute.xlu0 %1458 }
0x18b1   :  { %v2657_v60 = vadd.f32 %v1459_v2, %v1451_v53 }
0x18b3   :  { %2047 = vtanh.f32 %v2657_v60  ;;  %v1853_v48 = vrot.slane %v2657_v60, 2 }
0x18c0   :  { %v2048_v54 = vpop.eup %2047 }
0x18c1   :  { %1464 = vrot.lane.b32.xlu1 %v2048_v54, %s2117_s8 }
0x1933   :  { %v1465_v13 = vpop.permute.xlu1 %1464 }
0x1934   :  { %v2661_v16 = vmul.f32 %v2046_v7, %v1465_v13 }
0x1936   :  { %v1631_v17 = vrot.slane %v2661_v16, %v2365_v32  ;;  %v1845_v4 = vrot.slane %v2661_v16, 6 }
0x1938   :  { %v1632_v19 = vcombine.high %v1631_v17, %v1631_v17  ;;  %v1639_v14 = vrot.slane %v1631_v17, %v2365_v32 }
0x193a   :  { %v1646_v23 = vrot.slane %v1632_v19, %v2365_v32  ;;  %v1710_v15 = vrot.slane %v1639_v14, %v2296_v50 }
0x193c   :  { %v1736_v56 = vsel %vm1735_vm9, %v1733_v18, %v1710_v15  ;;  %v1714_v58 = vrot.slane %v1646_v23, %v2296_v50 }
0x193d   :  { %1740 = vrot.lane.b32.xlu0 %v1736_v56, %s2116_s4 }
0x193e   :  { %v1737_v27 = vsel %vm1735_vm9, %v1734_v57, %v1714_v58  ;;  %v1857_v57 = vsel %vm1720_vm4, %v2639_v3, %v1845_v4 }
0x193f   :  { %1742 = vrot.lane.b32.xlu1 %v1737_v27, %s2116_s4 }
0x19af   :  { %v1741_v28 = vpop.permute.xlu0 %1740 }
0x19b0   :  { %v1746_v30 = vsel %vm247_vm1, %v1741_v28, 0.0 }
0x19b1   :  { %1747 = vadd.xlane.f32.xlu0 %v1746_v30  ;;  %v1743_v33 = vpop.permute.xlu1 %1742 }
0x19b2   :  { %v1749_v36 = vsel %vm247_vm1, %v1743_v33, 0.0 }
0x19b3   :  { %1750 = vadd.xlane.f32.xlu1 %v1749_v36 }
0x1a3a   :  { %v1748_v37 = vpop.xlane.xlu0 %1747 }
0x1a3b   :  { %v1753_v32 = vmul.f32 0.03125, %v1748_v37 }
0x1a3c   :  { %v1751_v34 = vpop.xlane.xlu1 %1750 }
0x1a3d   :  { %v1755_v38 = vsub.f32 %v1736_v56, %v1753_v32  ;;  %v1754_v11 = vmul.f32 0.03125, %v1751_v34 }
0x1a3f   :  { %v1756_v42 = vsub.f32 %v1737_v27, %v1754_v11  ;;  %v1757_v50 = vmul.f32 %v1755_v38, %v1755_v38 }
0x1a41   :  { %1761 = vrot.lane.b32.xlu0 %v1757_v50, %s2116_s4  ;;  %v1758_v41 = vmul.f32 %v1756_v42, %v1756_v42 }
0x1a43   :  { %1763 = vrot.lane.b32.xlu1 %v1758_v41, %s2116_s4 }
0x1ab3   :  { %v1762_v43 = vpop.permute.xlu0 %1761 }
0x1ab4   :  { %v1767_v9 = vsel %vm247_vm1, %v1762_v43, 0.0 }
0x1ab5   :  { %1768 = vadd.xlane.f32.xlu0 %v1767_v9  ;;  %v1764_v44 = vpop.permute.xlu1 %1763 }
0x1ab6   :  { %v1770_v45 = vsel %vm247_vm1, %v1764_v44, 0.0 }
0x1ab7   :  { %1771 = vadd.xlane.f32.xlu1 %v1770_v45 }
0x1ac8   :  { %1849 = vrot.lane.b32.xlu1 %v1848_v46, %s2117_s8 }
0x1b3e   :  { %v1769_v63 = vpop.xlane.xlu0 %1768 }
0x1b3f   :  { %v1773_v0 = vmul.f32 0.03125, %v1769_v63 }
0x1b40   :  { %v1772_v24 = vpop.xlane.xlu1 %1771 }
0x1b41   :  { %v1775_v22 = vadd.f32 1e-05, %v1773_v0  ;;  %v1774_v25 = vmul.f32 0.03125, %v1772_v24 }
0x1b43   :  { %2049 = vrsqrt.f32 %v1775_v22  ;;  %v1776_v26 = vadd.f32 1e-05, %v1774_v25 }
0x1b44   :  { %v1850_v52 = vpop.permute.xlu1 %1849 }
0x1b45   :  { %2051 = vrsqrt.f32 %v1776_v26  ;;  %v1858_v59 = vsel %vm1726_vm6, %v1857_v57, %v1850_v52 }
0x1b50   :  { %v2050_v10 = vpop.eup %2049 }
0x1b51   :  { %v1779_v31 = vmul.f32 %v2050_v10, %v1755_v38 }
0x1b52   :  { %v2052_v21 = vpop.eup %2051 }
0x1b53   :  { %v1780_v39 = vmul.f32 %v2052_v21, %v1756_v42 }
0x1b55   :  { %v1781_v40 = vpack.c.bf16 %v1780_v39, %v1779_v31 }
0x1b57   :  { %1787 = vrot.lane.b32.xlu0 %v1781_v40, %s2116_s4 }
0x1b5b   :  { %1854 = vrot.lane.b32.xlu0 %v1853_v48, %s2117_s8 }
0x1bc9   :  { %v1788_v18 = vpop.permute.xlu0 %1787 }
0x1bca   :  { %1932 = vmatmul.mubr.msk.bf16.vlgmr.msra.gmra.mxu0 %vm247_vm1, %v1788_v18 }
0x1bcd   :  { %v1855_v29 = vpop.permute.xlu0 %1854 }
0x1bce   :  { %v1859_v5 = vsel %vm1732_vm8, %v1858_v59, %v1855_v29 }
0x1bcf   :  { %1861 = vrot.lane.b32.xlu1 %v1859_v5, %s2116_s4 }
0x1c41   :  { %v1862_v35 = vpop.permute.xlu1 %1861 }
0x1c42   :  { %v1864_v1 = vsel %vm247_vm1, %v1862_v35, 0.0 }
0x1c43   :  { %1867 = vst [vmem:[%s2710_s6 + $0x10] sm:$0xff] %v1864_v1 }
0x1c8a   :  { %v1838_v20 = vpop.f32.mrf.mxu0 }
0x1c8b   :  { %v1839_v3 = vadd.f32 %v1920_v8, %v1838_v20 }
0x1c8c   :  { %v1933_v62 = vpop.f32.mrf.mxu0 }
0x1c8d   :  { %1865 = vst [vmem:[%s2710_s6] sm:$0xff] %v1839_v3 }
0x1c8e   :  { %v1841_v47 = vpop.f32.mrf.mxu0 }
0x1c8f   :  { %v1842_v7 = vadd.f32 %v1920_v8, %v1841_v47 }
0x1c90   :  { %v1934_v49 = vpop.f32.mrf.mxu0 }
0x1c91   :  { %1866 = vst [vmem:[%s2710_s6 + $0x8] sm:$0xff] %v1842_v7 }
0x1c92   :  { %1872 = vsyncpa [#allocation3], 1 }
0x1c93   :  { %1873 = vsyncpa [#allocation5], 1 }

</bundles_post_ra>
